<compile_context>
chip_gen: v7x
topology: tpu7x:2x2x1
jax: 0.10.0
libtpu: 0.0.40
codegen_flags: <defaults>
</compile_context>

<pallas_src>
import jax
import jax.numpy as jnp
from jax.experimental import pallas as pl
from jax.experimental.pallas import tpu as pltpu

_VMEM_LIMIT_BYTES = 32 * 1024 * 1024


def _fused_mlp_kernel(x_ref, w1_ref, b1_ref, w2_ref, b2_ref, w3_ref, b3_ref,
                      o_ref, h2_acc):
    """One fc1 output-column block + fc2 partial contraction; finalize on last step.

    x_ref  : (M, 4096)  bf16, resident every step
    w1_ref : (4096, tn) bf16 column block of fc1 weights
    b1_ref : (1, tn)    f32 column block of fc1 bias
    w2_ref : (tn, 512)  bf16 row block of fc2 weights
    b2_ref : (1, 512)   f32
    w3_ref : (1, 512)   f32 (fc3 weights, transposed)
    b3_ref : (1, 1)     f32
    o_ref  : (M, 1)     f32 output (written only on last step)
    h2_acc : (M, 512)   f32 scratch, carried across grid steps
    """
    j = pl.program_id(0)

    @pl.when(j == 0)
    def _():
        h2_acc[...] = jnp.zeros_like(h2_acc)

    # fc1 column block: relu(x @ w1_blk + b1_blk)   (bf16 x bf16 -> f32 acc)
    h1_blk = jnp.dot(x_ref[...], w1_ref[...], preferred_element_type=jnp.float32)
    h1_blk = jnp.maximum(h1_blk + b1_ref[...], 0.0)

    # fc2 partial contraction over this column block of h1.
    h2_acc[...] += jnp.dot(h1_blk.astype(jnp.bfloat16), w2_ref[...],
                           preferred_element_type=jnp.float32)

    @pl.when(j == pl.num_programs(0) - 1)
    def _():
        h2 = jnp.maximum(h2_acc[...] + b2_ref[...], 0.0)          # (M, 512) f32
        # fc3 via VPU broadcast-multiply + XLU lane reduction (keeps MXU idle,
        # avoids a masked 1-lane MXU result pop).
        logit = jnp.sum(h2 * w3_ref[...], axis=-1, keepdims=True) + b3_ref[...]
        o_ref[...] = jax.nn.sigmoid(logit).astype(o_ref.dtype)


def classifier_mlp_forward(x, params, *, tn=256):
    """sigmoid(relu(relu(x @ w1 + b1) @ w2 + b2) @ w3 + b3), single pallas_call."""
    w1, b1, w2, b2, w3, b3 = params
    M, K1 = x.shape
    K1w, N1 = w1.shape
    N1w, N2 = w2.shape
    N2w, N3 = w3.shape
    assert K1 == K1w and N1 == N1w and N2 == N2w and N3 == 1
    assert b1.shape == (N1,) and b2.shape == (N2,) and b3.shape == (N3,)
    assert N1 % tn == 0, f"tn={tn} must divide fc1 output width {N1}"

    # bf16 weight/activation streaming; f32 accumulation inside the kernel.
    x_bf = x.astype(jnp.bfloat16)
    w1_bf = w1.astype(jnp.bfloat16)
    w2_bf = w2.astype(jnp.bfloat16)

    grid = (N1 // tn,)

    return pl.pallas_call(
        _fused_mlp_kernel,
        out_shape=jax.ShapeDtypeStruct((M, N3), jnp.float32),
        grid_spec=pltpu.PrefetchScalarGridSpec(
            num_scalar_prefetch=0,
            grid=grid,
            in_specs=[
                pl.BlockSpec((M, K1), lambda j: (0, 0)),    # x: small, resident
                pl.BlockSpec((K1, tn), lambda j: (0, j)),   # w1 column block (2 MiB bf16)
                pl.BlockSpec((1, tn), lambda j: (0, j)),    # b1 column block
                pl.BlockSpec((tn, N2), lambda j: (j, 0)),   # w2 row block (256 KiB bf16)
                pl.BlockSpec((1, N2), lambda j: (0, 0)),    # b2, resident
                pl.BlockSpec((1, N2), lambda j: (0, 0)),    # w3^T, resident
                pl.BlockSpec((1, 1), lambda j: (0, 0)),     # b3
            ],
            out_specs=pl.BlockSpec((M, N3), lambda j: (0, 0)),
            scratch_shapes=[pltpu.VMEM((M, N2), jnp.float32)],  # h2 accumulator
        ),
        compiler_params=pltpu.CompilerParams(
            # Carried h2 scratch + last-step-only output write => reduction-style
            # grid axis; "arbitrary", not "parallel".
            dimension_semantics=("arbitrary",),
            vmem_limit_bytes=_VMEM_LIMIT_BYTES,
        ),
    )(x_bf, w1_bf, b1.reshape(1, N1), w2_bf, b2.reshape(1, N2),
      w3.reshape(1, N2), b3.reshape(1, 1))


def init_params(key):
    """Deterministic parameter init (PyTorch Linear-style uniform fan-in bounds)."""
    dims = [(4096, 2048), (2048, 512), (512, 1)]
    params = []
    for i, (fan_in, fan_out) in enumerate(dims):
        kw, kb = jax.random.split(jax.random.fold_in(key, i))
        bound = 1.0 / jnp.sqrt(jnp.float32(fan_in))
        w = jax.random.uniform(kw, (fan_in, fan_out), jnp.float32,
                               minval=-bound, maxval=bound)
        b = jax.random.uniform(kb, (fan_out,), jnp.float32,
                               minval=-bound, maxval=bound)
        params += [w, b]
    return tuple(params)


def _reference_forward_f32(x, params):
    """Pure f32 reference (the original PyTorch semantics)."""
    w1, b1, w2, b2, w3, b3 = params
    h1 = jnp.maximum(x @ w1 + b1, 0.0)
    h2 = jnp.maximum(h1 @ w2 + b2, 0.0)
    return jax.nn.sigmoid(h2 @ w3 + b3)


def _reference_forward_bf16(x, params):
    """Precision-matched reference (bf16 matmul inputs, f32 accumulation)."""
    w1, b1, w2, b2, w3, b3 = params
    h1 = jnp.dot(x.astype(jnp.bfloat16), w1.astype(jnp.bfloat16),
                 preferred_element_type=jnp.float32) + b1
    h1 = jnp.maximum(h1, 0.0)
    h2 = jnp.dot(h1.astype(jnp.bfloat16), w2.astype(jnp.bfloat16),
                 preferred_element_type=jnp.float32) + b2
    h2 = jnp.maximum(h2, 0.0)
    return jax.nn.sigmoid(h2 @ w3 + b3)


if __name__ == "__main__":
    key = jax.random.PRNGKey(0)
    k_x, k_p = jax.random.split(key)

    batch = 8
    x = jax.random.normal(k_x, (batch, 4096), jnp.float32)
    params = init_params(k_p)

    out = jax.block_until_ready(classifier_mlp_forward(x, params))
    assert out.shape == (batch, 1), out.shape

    # Tight check vs. a precision-matched (bf16-weight) reference.
    ref_bf16 = _reference_forward_bf16(x, params)
    assert jnp.allclose(out, ref_bf16, atol=1e-3, rtol=0.0), (
        float(jnp.max(jnp.abs(out - ref_bf16))))
    # Loose check vs. the pure-f32 reference (bf16 weight quantization error).
    ref_f32 = _reference_forward_f32(x, params)
    assert jnp.allclose(out, ref_f32, atol=1e-2, rtol=0.0), (
        float(jnp.max(jnp.abs(out - ref_f32))))

    print("KERNEL_OK")
</pallas_src>

<mosaic_0001>
module attributes {stable_mosaic.version = 11 : i64} {
  func.func @_fused_mlp_kernel(%arg0: i32, %arg1: memref<8x4096xbf16, #tpu.memory_space<vmem>>, %arg2: memref<4096x256xbf16, #tpu.memory_space<vmem>>, %arg3: memref<1x256xf32, #tpu.memory_space<vmem>>, %arg4: memref<256x512xbf16, #tpu.memory_space<vmem>>, %arg5: memref<1x512xf32, #tpu.memory_space<vmem>>, %arg6: memref<1x512xf32, #tpu.memory_space<vmem>>, %arg7: memref<1x1xf32, #tpu.memory_space<vmem>>, %arg8: memref<8x1xf32, #tpu.memory_space<vmem>>, %arg9: memref<8x512xf32, #tpu.memory_space<vmem>>) attributes {dimension_semantics = [#tpu.dimension_semantics<arbitrary>], iteration_bounds = array<i64: 8>, scalar_prefetch = 0 : i64, scratch_operands = 1 : i64, tpu.core_type = #tpu.core_type<tc>, window_params = [{pipeline_mode = #tpu.pipeline_mode<synchronous>, transform_indices = @transform_0, window_bounds = array<i64: 8, 4096>}, {transform_indices = @transform_1, window_bounds = array<i64: 4096, 256>}, {transform_indices = @transform_2, window_bounds = array<i64: 1, 256>}, {transform_indices = @transform_3, window_bounds = array<i64: 256, 512>}, {pipeline_mode = #tpu.pipeline_mode<synchronous>, transform_indices = @transform_4, window_bounds = array<i64: 1, 512>}, {pipeline_mode = #tpu.pipeline_mode<synchronous>, transform_indices = @transform_5, window_bounds = array<i64: 1, 512>}, {pipeline_mode = #tpu.pipeline_mode<synchronous>, transform_indices = @transform_6, window_bounds = array<i64: 1, 1>}, {pipeline_mode = #tpu.pipeline_mode<synchronous>, transform_indices = @transform_7, window_bounds = array<i64: 8, 1>}]} {
    %c0_i32 = arith.constant 0 : i32
    %0 = arith.cmpi eq, %arg0, %c0_i32 : i32
    %1 = arith.extui %0 : i1 to i32
    %c0_i32_0 = arith.constant 0 : i32
    %2 = arith.cmpi ne, %1, %c0_i32_0 : i32
    scf.if %2 {
      %cst_15 = arith.constant 0.000000e+00 : f32
      %20 = vector.broadcast %cst_15 : f32 to vector<8x512xf32>
      %c0_16 = arith.constant 0 : index
      %c0_17 = arith.constant 0 : index
      %21 = vector.load %arg9[%c0_16, %c0_17] : memref<8x512xf32, #tpu.memory_space<vmem>>, vector<8x512xf32>
      tpu.vector_store %arg9[%c0_16, %c0_17], %20 {strides = array<i32>} : memref<8x512xf32, #tpu.memory_space<vmem>>, vector<8x512xf32>,
    } else {
    }
    %c0 = arith.constant 0 : index
    %c0_1 = arith.constant 0 : index
    %3 = vector.load %arg1[%c0, %c0_1] : memref<8x4096xbf16, #tpu.memory_space<vmem>>, vector<8x4096xbf16>
    %c0_2 = arith.constant 0 : index
    %c0_3 = arith.constant 0 : index
    %4 = vector.load %arg2[%c0_2, %c0_3] : memref<4096x256xbf16, #tpu.memory_space<vmem>>, vector<4096x256xbf16>
    %cst = arith.constant dense<0.000000e+00> : vector<8x256xf32>
    %5 = tpu.matmul %3, %4, %cst {dimension_numbers = #tpu.dot_dimension_numbers<[1], [0], [0], [1], [0, 0, 1, 1], [], []>} : vector<8x4096xbf16>, vector<4096x256xbf16>, vector<8x256xf32> -> vector<8x256xf32>
    %c0_4 = arith.constant 0 : index
    %c0_5 = arith.constant 0 : index
    %6 = vector.load %arg3[%c0_4, %c0_5] : memref<1x256xf32, #tpu.memory_space<vmem>>, vector<1x256xf32>
    %7 = vector.broadcast %6 : vector<1x256xf32> to vector<8x256xf32>
    %8 = arith.addf %5, %7 : vector<8x256xf32>
    %cst_6 = arith.constant 0.000000e+00 : f32
    %9 = vector.broadcast %cst_6 : f32 to vector<8x256xf32>
    %10 = arith.maximumf %8, %9 : vector<8x256xf32>
    %c0_7 = arith.constant 0 : index
    %c0_8 = arith.constant 0 : index
    %11 = vector.load %arg9[%c0_7, %c0_8] : memref<8x512xf32, #tpu.memory_space<vmem>>, vector<8x512xf32>
    %12 = arith.truncf %10 : vector<8x256xf32> to vector<8x256xbf16>
    %c0_9 = arith.constant 0 : index
    %c0_10 = arith.constant 0 : index
    %13 = vector.load %arg4[%c0_9, %c0_10] : memref<256x512xbf16, #tpu.memory_space<vmem>>, vector<256x512xbf16>
    %cst_11 = arith.constant dense<0.000000e+00> : vector<8x512xf32>
    %14 = tpu.matmul %12, %13, %cst_11 {dimension_numbers = #tpu.dot_dimension_numbers<[1], [0], [0], [1], [0, 0, 1, 1], [], []>} : vector<8x256xbf16>, vector<256x512xbf16>, vector<8x512xf32> -> vector<8x512xf32>
    %15 = arith.addf %11, %14 : vector<8x512xf32>
    %c0_12 = arith.constant 0 : index
    %c0_13 = arith.constant 0 : index
    %16 = vector.load %arg9[%c0_12, %c0_13] : memref<8x512xf32, #tpu.memory_space<vmem>>, vector<8x512xf32>
    tpu.vector_store %arg9[%c0_12, %c0_13], %15 {strides = array<i32>} : memref<8x512xf32, #tpu.memory_space<vmem>>, vector<8x512xf32>,
    %c7_i32 = arith.constant 7 : i32
    %17 = arith.cmpi eq, %arg0, %c7_i32 : i32
    %18 = arith.extui %17 : i1 to i32
    %c0_i32_14 = arith.constant 0 : i32
    %19 = arith.cmpi ne, %18, %c0_i32_14 : i32
    scf.if %19 {
      %c0_15 = arith.constant 0 : index
      %c0_16 = arith.constant 0 : index
      %20 = vector.load %arg9[%c0_15, %c0_16] : memref<8x512xf32, #tpu.memory_space<vmem>>, vector<8x512xf32>
      %c0_17 = arith.constant 0 : index
      %c0_18 = arith.constant 0 : index
      %21 = vector.load %arg5[%c0_17, %c0_18] : memref<1x512xf32, #tpu.memory_space<vmem>>, vector<1x512xf32>
      %22 = vector.broadcast %21 : vector<1x512xf32> to vector<8x512xf32>
      %23 = arith.addf %20, %22 : vector<8x512xf32>
      %cst_19 = arith.constant 0.000000e+00 : f32
      %24 = vector.broadcast %cst_19 : f32 to vector<8x512xf32>
      %25 = arith.maximumf %23, %24 : vector<8x512xf32>
      %c0_20 = arith.constant 0 : index
      %c0_21 = arith.constant 0 : index
      %26 = vector.load %arg6[%c0_20, %c0_21] : memref<1x512xf32, #tpu.memory_space<vmem>>, vector<1x512xf32>
      %27 = vector.broadcast %26 : vector<1x512xf32> to vector<8x512xf32>
      %28 = arith.mulf %25, %27 : vector<8x512xf32>
      %cst_22 = arith.constant dense<0.000000e+00> : vector<8xf32>
      %29 = vector.multi_reduction <add>, %28, %cst_22 [1] : vector<8x512xf32> to vector<8xf32>
      %30 = vector.shape_cast %29 : vector<8xf32> to vector<8x1xf32>
      %c0_23 = arith.constant 0 : index
      %c0_24 = arith.constant 0 : index
      %31 = vector.load %arg7[%c0_23, %c0_24] : memref<1x1xf32, #tpu.memory_space<vmem>>, vector<1x1xf32>
      %32 = vector.broadcast %31 : vector<1x1xf32> to vector<8x1xf32>
      %33 = arith.addf %30, %32 : vector<8x1xf32>
      %34 = arith.negf %33 : vector<8x1xf32>
      %35 = math.exp %34 : vector<8x1xf32>
      %cst_25 = arith.constant 1.000000e+00 : f32
      %36 = vector.broadcast %cst_25 : f32 to vector<8x1xf32>
      %37 = arith.addf %36, %35 : vector<8x1xf32>
      %38 = arith.divf %36, %37 : vector<8x1xf32>
      %c0_26 = arith.constant 0 : index
      %c0_27 = arith.constant 0 : index
      %39 = vector.load %arg8[%c0_26, %c0_27] : memref<8x1xf32, #tpu.memory_space<vmem>>, vector<8x1xf32>
      tpu.vector_store %arg8[%c0_26, %c0_27], %38 {strides = array<i32>} : memref<8x1xf32, #tpu.memory_space<vmem>>, vector<8x1xf32>,
    } else {
    }
    return
  }
  func.func @transform_0(%arg0: i32) -> (i32, i32) {
    %c0_i32 = arith.constant 0 : i32
    %c0_i32_0 = arith.constant 0 : i32
    %c0_i32_1 = arith.constant 0 : i32
    return %c0_i32, %c0_i32_0 : i32, i32
  }
  func.func @transform_1(%arg0: i32) -> (i32, i32) {
    %c0_i32 = arith.constant 0 : i32
    %c0_i32_0 = arith.constant 0 : i32
    return %c0_i32, %arg0 : i32, i32
  }
  func.func @transform_2(%arg0: i32) -> (i32, i32) {
    %c0_i32 = arith.constant 0 : i32
    %c0_i32_0 = arith.constant 0 : i32
    return %c0_i32, %arg0 : i32, i32
  }
  func.func @transform_3(%arg0: i32) -> (i32, i32) {
    %c0_i32 = arith.constant 0 : i32
    %c0_i32_0 = arith.constant 0 : i32
    return %arg0, %c0_i32 : i32, i32
  }
  func.func @transform_4(%arg0: i32) -> (i32, i32) {
    %c0_i32 = arith.constant 0 : i32
    %c0_i32_0 = arith.constant 0 : i32
    %c0_i32_1 = arith.constant 0 : i32
    return %c0_i32, %c0_i32_0 : i32, i32
  }
  func.func @transform_5(%arg0: i32) -> (i32, i32) {
    %c0_i32 = arith.constant 0 : i32
    %c0_i32_0 = arith.constant 0 : i32
    %c0_i32_1 = arith.constant 0 : i32
    return %c0_i32, %c0_i32_0 : i32, i32
  }
  func.func @transform_6(%arg0: i32) -> (i32, i32) {
    %c0_i32 = arith.constant 0 : i32
    %c0_i32_0 = arith.constant 0 : i32
    %c0_i32_1 = arith.constant 0 : i32
    return %c0_i32, %c0_i32_0 : i32, i32
  }
  func.func @transform_7(%arg0: i32) -> (i32, i32) {
    %c0_i32 = arith.constant 0 : i32
    %c0_i32_0 = arith.constant 0 : i32
    %c0_i32_1 = arith.constant 0 : i32
    return %c0_i32, %c0_i32_0 : i32, i32
  }
}

</mosaic_0001>

<bundles_post_ra>
// kernel: tpu_custom_call.1
= control target key start
LH: loop header
LB: loop body
LE: loop exit
PB: predicated region body
PF: predicated region fallthrough
CT: control target
= control target key end

     0   :  { %s7889_s0 = inlined_call_operand.hbm [shape: bf16[8,4096], index: 0, kind: input, shape index: {}]   ;;  %s7890_s1 = inlined_call_operand.hbm [shape: bf16[4096,2048], index: 1, kind: input, shape index: {}]   ;;  %s7891_s2 = inlined_call_operand.hbm [shape: f32[1,2048], index: 2, kind: input, shape index: {}]   ;;  %s7892_s3 = inlined_call_operand.hbm [shape: bf16[2048,512], index: 3, kind: input, shape index: {}]   ;;  %s7893_s4 = inlined_call_operand.hbm [shape: f32[1,512], index: 4, kind: input, shape index: {}]   ;;  %s7894_s5 = inlined_call_operand.hbm [shape: f32[1,512], index: 5, kind: input, shape index: {}]   ;;  %s7895_s6 = inlined_call_operand.<no memory space> [shape: f32[1,1], index: 6, kind: input, shape index: {}]   ;;  %s7896_s7 = inlined_call_operand.vmem [shape: f32[8,1], index: 7, kind: output, shape index: {}]  }
   0x1   :  { %7912 = sst [smem:[#allocation22_spill]] %s7890_s1  ;;  %v12_v0 = vstv %s7895_s6 }
   0x2   :  { %7913 = sst [smem:[#allocation23_spill]] %s7893_s4  ;;  %13 = vst [vmem:[#allocation3] sm:$0x1] %v12_v0 }
   0x3   :  { %7914 = sst [smem:[#allocation24_spill]] %s7896_s7 }
   0x4   :  { %14 = vsyncpa [#allocation5], 0 }
   0x5   :  { %15 = vsyncpa [#allocation7], 0 }
   0x6   :  { %17 = vsyncpa [#allocation7 + $0x1], 0 }
   0x7   :  { %18 = vsyncpa [#allocation10], 0 }
   0x8   :  { %20 = vsyncpa [#allocation10 + $0x1], 0 }
   0x9   :  { %21 = vsyncpa [#allocation13], 0  ;;  %s6927_s26 = smov 0   ;;  %s6929_s27 = smov 0  }
   0xa   :  { %s6931_s28 = smov 0   ;;  %s6933_s29 = smov 0  }
   0xb LB: > { %7915 = sst [smem:[#allocation19_spill]] %s6866_s28  ;;  %s6946_s6 = sadd.s32 4294967295, %s6870_s29   ;;  %s6870_s29 = sphi %s6933_s29, %s7943_s29   ;;  %s6866_s28 = sphi %s6931_s28, %s7945_s28   ;;  %s6862_s27 = sphi %s6929_s27, %s7947_s27   ;;  %s6858_s26 = sphi %s6927_s26, %s7946_s26  }
   0xc   : > { %s6949_s30 = sadd.s32 1, %s6870_s29   ;;  %s55_s9 = sadd.s32 1, %s6866_s28 }
   0xd   : > { %7916 = sst [smem:[#allocation20_spill]] %s6949_s30  ;;  %s52_s8 = ssub.s32 %s6870_s29, %s6949_s30 }
   0xe   : > { %p53_p0 = scmp.eq.s32.totalorder %s52_s8, 0  ;;  %p62_p1 = scmp.ne.s32.totalorder %s6866_s28, %s6862_s27 }
   0xf   : > { %p63_p2 = scmp.eq.s32.totalorder %s6870_s29, 0  ;;  %p68_p3 = scmp.ne.s32.totalorder %s6862_s27, %s6858_s26 }
  0x10   : > { %s6959_s10 = scalar_select %p53_p0, %s6866_s28, %s55_s9  }
  0x11   : > { %p6961_p4 = por %p63_p2, %p62_p1  ;;  %p7897_p5 = scmp.eq.s32.totalorder %s6946_s6, 0 }
  0x12   : > { %7917 = sst [smem:[#allocation21_spill]] %s6959_s10  ;;  %p4960_p6 = scmp.ge.s32.totalorder %s6870_s29, 1 }
  0x13   : > { %p215_p7 = scmp.lt.s32.totalorder %s6870_s29, 9  ;;  %p6970_p8 = por %p7897_p5, %p68_p3 }
  0x14   : > { %s6872_s14 = smov [#allocation11]   ;;  %p5701_p12 = scmp.lt.s32.totalorder %s6870_s29, 8 }
  0x15   : > { %s7919_s12 = scalar_select %p6970_p8, 1, 0 }
  0x16   : > { %p6975_p10 = pnand %p4960_p6, %p215_p7  ;;  %s239_s15 = sshll.u32 %s6872_s14, 4  ;;  %s240_s15 = int_to_ptr.vmem [resolvable:$true] %s239_s15 }
  0x17   : > { %s7905_s16 = sand.u32 1, %s6870_s29   ;;  %p6991_p0 = pnand %p5701_p12, %p6961_p4 }
  0x18   : > { %s7920_s13 = scalar_select %p6975_p10, 1, 0 }
  0x19   : > { %p5678_p11 = pneg %p6975_p10  ;;  %s6996_s19 = sand.u32 1, %s6866_s28  }
  0x1a   : > { %s7922_s18 = scalar_select %p6991_p0, 1, 0 }
  0x1b   : > { %p6985_p13 = pnand %p5678_p11, %p7897_p5  ;;  %s4965_s20 = sshll.u32 %s6996_s19, 12 }
  0x1c   : > { %s7923_s4 = sld [smem:[#allocation23_spill]] }
  0x1d   : > { %s7921_s17 = scalar_select %p6985_p13, 1, 0 }
  0x1e   : > { %p7007_p2 = pneg %p6985_p13 }
  0x20   : > { %s7924_s26 = scalar_select %p7007_p2, 1, 0 }
  0x22   : > { %s6646_s23 = scalar_lea.hbm %s7923_s4, 64 }
  0x23   : > { %p6647_p1 = scmp.ne.s32.totalorder %s7923_s4, %s6646_s23  ;;  %p6653_p6 = scmp.lt.u32.totalorder %s6646_s23, %s7923_s4 }
  0x25   : > { %p6649_p3 = pnand %p7007_p2, %p6647_p1 }
  0x27   : > { %p6650_p4 = pneg %p6649_p3 }
  0x29   : > { %p6655_p7 = pnand %p6653_p6, %p6650_p4 }
  0x2b   : > { %6658 = shalt.err (!%p6655_p7)
}
  0x2c   : > { %s6659_s11 = scalar_lea.vmem %s240_s15, 64  ;;  %p6667_p5 = scmp.lt.s32.totalorder %s240_s15, %s240_s15 }
  0x2d   : > { %p6660_p11 = scmp.ne.s32.totalorder %s240_s15, %s6659_s11  ;;  %p6668_p8 = scmp.lt.s32.totalorder %s6659_s11, %s6659_s11 }
  0x2f   : > { %p6662_p12 = pnand %p6660_p11, %p7007_p2  ;;  %p6669_p10 = por %p6668_p8, %p6667_p5 }
  0x31   : > { %p6663_p9 = pneg %p6662_p12 }
  0x33   : > { %p6670_p0 = pnand %p6669_p10, %p6663_p9 }
  0x35   : > { %6673 = shalt.err (!%p6670_p0)
}
  0x36   : > { %5684 = dma.hbm_to_vmem [thread:$0]  (!%p6985_p13), %s7923_s4, 64, %s240_s15, [#allocation10]  }
  0x37   : > { %s5596_s22 = sshll.u32 %s6870_s29, 7  ;;  %s268_s23 = scalar_lea.vmem [#allocation6], %s4965_s20 }
  0x38   : > { %s275_s24 = sshll.u32 %s268_s23, 4  ;;  %s7925_s1 = sld [smem:[#allocation22_spill]]  ;;  %s7029_s24 = int_to_ptr.vmem [resolvable:$true] %s275_s24 }
  0x39   : > { %s7033_s11 = scalar_lea.sflag [#allocation7], %s7905_s16  ;;  %p7926_p8 = scmp.ne.s32.totalorder %s7922_s18, 0 }
  0x3b   : > { %p7039_p9 = pneg %p7926_p8 }
  0x3d   : > { %s7927_s15 = scalar_select %p7039_p9, 1, 0 }
  0x3e   : > { %s7027_s9 = scalar_lea.hbm %s7925_s1, %s5596_s22  ;;  %s6679_s22 = scalar_lea.hbm %s7925_s1, 524288 }
  0x3f   : > { %s6674_s14 = scalar_lea.hbm %s7027_s9, 65536  ;;  %p6680_p1 = scmp.lt.u32.totalorder %s7027_s9, %s7925_s1 }
  0x40   : > { %p6675_p5 = scmp.ne.s32.totalorder %s7027_s9, %s6674_s14  ;;  %p6681_p3 = scmp.lt.u32.totalorder %s6679_s22, %s6674_s14 }
  0x41   : > { %p6683_p6 = scmp.lt.u32.totalorder %s6674_s14, %s7027_s9 }
  0x42   : > { %p6677_p10 = pnand %p7039_p9, %p6675_p5  ;;  %p6682_p4 = por %p6681_p3, %p6680_p1 }
  0x44   : > { %p6678_p0 = pneg %p6677_p10  ;;  %p6684_p7 = por %p6683_p6, %p6682_p4 }
  0x46   : > { %p6685_p11 = pnand %p6684_p7, %p6678_p0 }
  0x48   : > { %6688 = shalt.err (!%p6685_p11)
}
  0x49   : > { %s6689_s8 = scalar_lea.vmem %s7029_s24, 65536  ;;  %s6873_s20 = smov [#allocation6]  }
  0x4a   : > { %p6690_p12 = scmp.ne.s32.totalorder %s7029_s24, %s6689_s8  ;;  %s6694_s21 = sshll.u32 %s6873_s20, 4  ;;  %s6695_s21 = int_to_ptr.vmem [resolvable:$false] %s6694_s21 }
  0x4b   : > { %s6696_s23 = scalar_lea.vmem %s6695_s21, 131072  ;;  %p6697_p13 = scmp.lt.s32.totalorder %s7029_s24, %s6695_s21 }
  0x4c   : > { %p6692_p5 = pnand %p6690_p12, %p7039_p9  ;;  %p6698_p2 = scmp.lt.s32.totalorder %s6696_s23, %s6689_s8 }
  0x4e   : > { %p6693_p10 = pneg %p6692_p5  ;;  %p6699_p1 = por %p6698_p2, %p6697_p13 }
  0x50   : > { %p6700_p3 = pnand %p6699_p1, %p6693_p10 }
  0x52   : > { %6703 = shalt.err (!%p6700_p3)
}
  0x53   : > { %s6874_s14 = smov 1024   ;;  %s6875_s22 = smov 128  }
  0x54   : > { %s6876_s25 = smov 8   ;;  %s6877_s16 = smov [#allocation4]  }
  0x55   : > { %5691 = dma.hbm_to_vmem [thread:$0]  (!%p7926_p8), %s7027_s9, 65536, %s7029_s24, %s7033_s11, %s6874_s14, %s6875_s22, %s6876_s25  }
  0x56   : > { %s228_s1 = sshll.u32 %s6877_s16, 4  ;;  %s6878_s20 = smov [#allocation12]   ;;  %s229_s1 = int_to_ptr.vmem [resolvable:$true] %s228_s1 }
  0x57   : > { %s250_s4 = sshll.u32 %s6878_s20, 4  ;;  %s6704_s23 = scalar_lea.hbm %s7889_s0, 2048  ;;  %s251_s4 = int_to_ptr.vmem [resolvable:$true] %s250_s4 }
  0x58   : > { %p6705_p13 = scmp.ne.s32.totalorder %s7889_s0, %s6704_s23  ;;  %p7928_p2 = scmp.ne.s32.totalorder %s7924_s26, 0 }
  0x59   : > { %p6711_p6 = scmp.lt.u32.totalorder %s6704_s23, %s7889_s0 }
  0x5a   : > { %p6707_p0 = pnand %p6705_p13, %p7928_p2 }
  0x5c   : > { %p6708_p4 = pneg %p6707_p0 }
  0x5e   : > { %p6713_p7 = pnand %p6711_p6, %p6708_p4 }
  0x60   : > { %6716 = shalt.err (!%p6713_p7)
}
  0x61   : > { %s6717_s16 = scalar_lea.vmem %s229_s1, 2048  ;;  %p6725_p10 = scmp.lt.s32.totalorder %s229_s1, %s229_s1 }
  0x62   : > { %p6718_p11 = scmp.ne.s32.totalorder %s229_s1, %s6717_s16  ;;  %p6726_p1 = scmp.lt.s32.totalorder %s6717_s16, %s6717_s16 }
  0x64   : > { %p6720_p12 = pnand %p6718_p11, %p7928_p2  ;;  %p6727_p3 = por %p6726_p1, %p6725_p10 }
  0x66   : > { %p6721_p5 = pneg %p6720_p12 }
  0x68   : > { %p6728_p8 = pnand %p6727_p3, %p6721_p5 }
  0x6a   : > { %6731 = shalt.err (!%p6728_p8)
}
  0x6b   : > { %p7929_p13 = scmp.ne.s32.totalorder %s7921_s17, 0  ;;  %s4968_s7 = sshll.u32 %s6996_s19, 1 }
  0x6c   : > { %s6732_s9 = scalar_lea.hbm %s7894_s5, 64 }
  0x6d   : > { %5681 = dma.hbm_to_vmem [thread:$0]  (!%p7929_p13), %s7889_s0, 2048, %s229_s1, [#allocation5]  }
  0x6e   : > { %p6733_p0 = scmp.ne.s32.totalorder %s7894_s5, %s6732_s9  ;;  %p6739_p6 = scmp.lt.u32.totalorder %s6732_s9, %s7894_s5 }
  0x70   : > { %p6735_p8 = pnand %p6733_p0, %p7928_p2 }
  0x72   : > { %p6736_p4 = pneg %p6735_p8 }
  0x74   : > { %p6741_p7 = pnand %p6739_p6, %p6736_p4 }
  0x76   : > { %6744 = shalt.err (!%p6741_p7)
}
  0x77   : > { %s6745_s1 = scalar_lea.vmem %s251_s4, 64  ;;  %p6753_p10 = scmp.lt.s32.totalorder %s251_s4, %s251_s4 }
  0x78   : > { %p6746_p11 = scmp.ne.s32.totalorder %s251_s4, %s6745_s1  ;;  %p6754_p1 = scmp.lt.s32.totalorder %s6745_s1, %s6745_s1 }
  0x7a   : > { %p6748_p12 = pnand %p6746_p11, %p7928_p2  ;;  %p6755_p3 = por %p6754_p1, %p6753_p10 }
  0x7c   : > { %p6749_p5 = pneg %p6748_p12 }
  0x7e   : > { %p6756_p9 = pnand %p6755_p3, %p6749_p5 }
  0x80   : > { %6759 = shalt.err (!%p6756_p9)
}
  0x81   : > { %5687 = dma.hbm_to_vmem [thread:$0]  (!%p7929_p13), %s7894_s5, 64, %s251_s4, [#allocation13]  }
  0x82   : > { %s5597_s23 = sshll.u32 %s6870_s29, 5  ;;  %s289_s10 = scalar_lea.vmem [#allocation8], %s4968_s7 }
  0x83   : > { %s7104_s26 = scalar_lea.hbm %s7891_s2, %s5597_s23  ;;  %s297_s30 = sshll.u32 %s289_s10, 4  ;;  %s298_s30 = int_to_ptr.vmem [resolvable:$true] %s297_s30 }
  0x84   : > { %s6760_s17 = scalar_lea.hbm %s7104_s26, 32  ;;  %p7930_p2 = scmp.ne.s32.totalorder %s7927_s15, 0 }
  0x85   : > { %p6761_p9 = scmp.ne.s32.totalorder %s7104_s26, %s6760_s17  ;;  %s6765_s9 = scalar_lea.hbm %s7891_s2, 256 }
  0x86   : > { %p6766_p13 = scmp.lt.u32.totalorder %s7104_s26, %s7891_s2  ;;  %p6767_p4 = scmp.lt.u32.totalorder %s6765_s9, %s6760_s17 }
  0x87   : > { %p6763_p0 = pnand %p6761_p9, %p7930_p2  ;;  %p6769_p7 = scmp.lt.u32.totalorder %s6760_s17, %s7104_s26 }
  0x88   : > { %p6768_p6 = por %p6767_p4, %p6766_p13 }
  0x89   : > { %p6764_p8 = pneg %p6763_p0 }
  0x8a   : > { %p6770_p11 = por %p6769_p7, %p6768_p6 }
  0x8c   : > { %p6771_p12 = pnand %p6770_p11, %p6764_p8 }
  0x8e   : > { %6774 = shalt.err (!%p6771_p12)
}
  0x8f   : > { %s6775_s7 = scalar_lea.vmem %s298_s30, 32  ;;  %s6879_s25 = smov [#allocation8]  }
  0x90   : > { %p6776_p5 = scmp.ne.s32.totalorder %s298_s30, %s6775_s7  ;;  %s6780_s20 = sshll.u32 %s6879_s25, 4  ;;  %s6781_s20 = int_to_ptr.vmem [resolvable:$false] %s6780_s20 }
  0x91   : > { %s6782_s1 = scalar_lea.vmem %s6781_s20, 64  ;;  %p6783_p3 = scmp.lt.s32.totalorder %s298_s30, %s6781_s20 }
  0x92   : > { %p6778_p10 = pnand %p6776_p5, %p7930_p2  ;;  %p6784_p9 = scmp.lt.s32.totalorder %s6782_s1, %s6775_s7 }
  0x94   : > { %p6779_p1 = pneg %p6778_p10  ;;  %p6785_p0 = por %p6784_p9, %p6783_p3 }
  0x96   : > { %p6786_p4 = pnand %p6785_p0, %p6779_p1 }
  0x98   : > { %6789 = shalt.err (!%p6786_p4)
}
  0x99   : > { %p7931_p13 = scmp.ne.s32.totalorder %s7922_s18, 0  ;;  %s4971_s21 = sshll.u32 %s6996_s19, 9 }
  0x9a   : > { %s5599_s8 = sshll.u32 %s6870_s29, 13  ;;  %s308_s10 = scalar_lea.vmem [#allocation9], %s4971_s21 }
  0x9b   : > { %5694 = dma.hbm_to_vmem [thread:$0]  (!%p7931_p13), %s7104_s26, 32, %s298_s30, %s7033_s11  }
  0x9c   : > { %s7129_s28 = scalar_lea.hbm %s7892_s3, %s5599_s8  ;;  %s316_s17 = sshll.u32 %s308_s10, 4  ;;  %s7131_s17 = int_to_ptr.vmem [resolvable:$true] %s316_s17 }
  0x9d   : > { %s7932_s24 = sand.u32 1, %s6870_s29   ;;  %s6790_s9 = scalar_lea.hbm %s7129_s28, 8192 }
  0x9e   : > { %s7135_s4 = scalar_lea.sflag [#allocation10], %s7932_s24  ;;  %p6791_p8 = scmp.ne.s32.totalorder %s7129_s28, %s6790_s9 }
  0x9f   : > { %s6795_s26 = scalar_lea.hbm %s7892_s3, 65536  ;;  %p6796_p11 = scmp.lt.u32.totalorder %s7129_s28, %s7892_s3 }
  0xa0   : > { %p6793_p6 = pnand %p6791_p8, %p7930_p2  ;;  %p6797_p12 = scmp.lt.u32.totalorder %s6795_s26, %s6790_s9 }
  0xa1   : > { %p6799_p10 = scmp.lt.u32.totalorder %s6790_s9, %s7129_s28 }
  0xa2   : > { %p6794_p7 = pneg %p6793_p6  ;;  %p6798_p5 = por %p6797_p12, %p6796_p11 }
  0xa4   : > { %p6800_p1 = por %p6799_p10, %p6798_p5 }
  0xa6   : > { %p6801_p3 = pnand %p6800_p1, %p6794_p7 }
  0xa8   : > { %6804 = shalt.err (!%p6801_p3)
}
  0xa9   : > { %s6805_s29 = scalar_lea.vmem %s7131_s17, 8192  ;;  %s6880_s22 = smov [#allocation9]  }
  0xaa   : > { %p6806_p9 = scmp.ne.s32.totalorder %s7131_s17, %s6805_s29  ;;  %s6810_s7 = sshll.u32 %s6880_s22, 4  ;;  %s6811_s7 = int_to_ptr.vmem [resolvable:$false] %s6810_s7 }
  0xab   : > { %s6812_s25 = scalar_lea.vmem %s6811_s7, 16384  ;;  %p6813_p8 = scmp.lt.s32.totalorder %s7131_s17, %s6811_s7 }
  0xac   : > { %p6808_p0 = pnand %p6806_p9, %p7930_p2  ;;  %p6814_p6 = scmp.lt.s32.totalorder %s6812_s25, %s6805_s29 }
  0xae   : > { %p6809_p4 = pneg %p6808_p0  ;;  %p6815_p11 = por %p6814_p6, %p6813_p8 }
  0xb0   : > { %p6816_p12 = pnand %p6815_p11, %p6809_p4 }
  0xb2   : > { %6819 = shalt.err (!%p6816_p12)
}
  0xb3   : > { %s6881_s20 = smov 256   ;;  %s6882_s1 = smov 16  }
  0xb4   : > { %5697 = dma.hbm_to_vmem [thread:$0]  (!%p7931_p13), %s7129_s28, 8192, %s7131_s17, %s7135_s4, %s6881_s20, %s6881_s20, %s6882_s1  }
  0xb5   : > { %p7933_p2 = scmp.ne.s32.totalorder %s7920_s13, 0 }
  0xb6   : > { %p7934_p7 = scmp.eq.s32.totalorder (!%p7933_p2), %s6946_s6, 0 }
  0xb7   : > { %328 = sbr.rel (%p7933_p2) target bundleno = 1480 (0x5c8), region = 48 }
  0xbe   : > { %6837 = dma.done.wait (%p7934_p7), [#allocation5], 2048   ;;  %p7935_p5 = pmov %p7934_p7 }
  0xbf   : > { %s334_s15 = sand.u32 1, %s6946_s6   ;;  %s336_s21 = sand.u32 1, %s6862_s27  }
  0xc0   : > { %6839 = vsyncadd (%p7935_p5), [#allocation5], 4294965248  ;;  %s4977_s8 = sshll.u32 %s336_s21, 12  ;;  %s335_s23 = scalar_lea.sflag [#allocation7], %s334_s15 }
  0xc1   : > { %s7167_s16 = scalar_lea.vmem [#allocation6], %s4977_s8  ;;  %p7936_p10 = scmp.ne.s32.totalorder %s7919_s12, 0 }
  0xc3   : > { %6841 = dma.done.wait (%p7936_p10), %s335_s23, 65568  }
  0xc4   : > { %6843 = vsyncadd (%p7936_p10), %s335_s23, 4294901728  ;;  %s4978_s13 = sshll.u32 %s336_s21, 1  ;;  %s4979_s18 = sshll.u32 %s336_s21, 9 }
  0xc5   : > { %s7173_s28 = scalar_lea.vmem [#allocation8], %s4978_s13  ;;  %s353_s10 = scalar_lea.sflag [#allocation10], %s334_s15 }
  0xc6   : > { %s7175_s17 = scalar_lea.vmem [#allocation9], %s4979_s18 }
  0xc7   : > { %6845 = dma.done.wait (%p7936_p10), %s353_s10, 8192  }
  0xc8   : > { %6847 = vsyncadd (%p7936_p10), %s353_s10, 4294959104  ;;  %p7937_p13 = pmov %p7935_p5 }
  0xc9   : > { %p7938_p1 = pmov %p7935_p5 }
  0xca   : > { %6849 = dma.done.wait (%p7937_p13), [#allocation10], 64  }
  0xcb   : > { %6851 = vsyncadd (%p7938_p1), [#allocation10], 4294967232  ;;  %p7939_p3 = pmov %p7938_p1 }
  0xcc   : > { %p7940_p9 = pmov %p7938_p1 }
  0xcd   : > { %6853 = dma.done.wait (%p7939_p3), [#allocation13], 64  }
  0xce   : > { %6855 = vsyncadd (%p7940_p9), [#allocation13], 4294967232  ;;  %p7941_p0 = scmp.ne.s32.totalorder %s6946_s6, 0 }
  0xcf   : > { %v6883_v1 = vmov (!%p7941_p0), 0.0  }
  0xd0   : > { %406 = sbr.rel (%p7941_p0) target bundleno = 215 (0xd7), region = 76  ;;  %407 = vst [vmem:[#allocation2] sm:$0xff] (!%p7941_p0), %v6883_v1  ;;  %408 = vst [vmem:[#allocation2 + $0x8] sm:$0xff] (!%p7941_p0), %v6883_v1 }
  0xd1   : > { %409 = vst [vmem:[#allocation2 + $0x10] sm:$0xff] (!%p7941_p0), %v6883_v1  ;;  %410 = vst [vmem:[#allocation2 + $0x18] sm:$0xff] (!%p7941_p0), %v6883_v1 }
  0xd7 PF: > { %v5746_v2 = vld [vmem:[%s7167_s16 + $0x4] ss:$8 sps:$4 sm:$0xff]   ;;  %v5750_v4 = vld [vmem:[%s7167_s16] ss:$8 sps:$4 sm:$0xff]   ;;  %v5752_v6 = vld [vmem:[%s7167_s16 + $0x14] ss:$8 sps:$4 sm:$0xff]  }
  0xd8   : > { %v5748_v3 = vld [vmem:[%s7167_s16 + $0x704] ss:$8 sps:$4 sm:$0xff]   ;;  %3623 = vmatprep.subr.bf16.mxu1 %v5746_v2  ;;  %v5751_v5 = vld [vmem:[%s7167_s16 + $0x700] ss:$8 sps:$4 sm:$0xff]   ;;  %v5754_v7 = vld [vmem:[%s7167_s16 + $0x714] ss:$8 sps:$4 sm:$0xff]  }
  0xd9   : > { %3910 = vmatprep.subr.bf16.mxu0 %v5748_v3  ;;  %3624 = vmatpush1.bf16.msra.mxu1 %v5750_v4  ;;  %v5756_v8 = vld [vmem:[%s7167_s16 + $0x10] ss:$8 sps:$4 sm:$0xff]   ;;  %v5758_v10 = vld [vmem:[%s7167_s16 + $0x24] ss:$8 sps:$4 sm:$0xff]   ;;  %v5762_v12 = vld [vmem:[%s7167_s16 + $0x20] ss:$8 sps:$4 sm:$0xff]  }
  0xda   : > { %3911 = vmatpush1.bf16.msra.mxu0 %v5751_v5  ;;  %3625 = vmatprep.subr.bf16.mxu1 %v5752_v6  ;;  %v5757_v9 = vld [vmem:[%s7167_s16 + $0x710] ss:$8 sps:$4 sm:$0xff]   ;;  %v5760_v11 = vld [vmem:[%s7167_s16 + $0x724] ss:$8 sps:$4 sm:$0xff]   ;;  %v5763_v13 = vld [vmem:[%s7167_s16 + $0x720] ss:$8 sps:$4 sm:$0xff]  }
  0xdb   : > { %3912 = vmatprep.subr.bf16.mxu0 %v5754_v7  ;;  %v5764_v14 = vld [vmem:[%s7167_s16 + $0x34] ss:$8 sps:$4 sm:$0xff]   ;;  %v5768_v16 = vld [vmem:[%s7167_s16 + $0x30] ss:$8 sps:$4 sm:$0xff]   ;;  %v5770_v18 = vld [vmem:[%s7167_s16 + $0x44] ss:$8 sps:$4 sm:$0xff]  }
  0xdc   : > { %v5766_v15 = vld [vmem:[%s7167_s16 + $0x734] ss:$8 sps:$4 sm:$0xff]   ;;  %v5769_v17 = vld [vmem:[%s7167_s16 + $0x730] ss:$8 sps:$4 sm:$0xff]   ;;  %v5772_v19 = vld [vmem:[%s7167_s16 + $0x744] ss:$8 sps:$4 sm:$0xff]  }
  0xdd   : > { %3626 = vmatpush1.bf16.msra.mxu1 %v5756_v8  ;;  %v5774_v20 = vld [vmem:[%s7167_s16 + $0x40] ss:$8 sps:$4 sm:$0xff]   ;;  %v5776_v22 = vld [vmem:[%s7167_s16 + $0x54] ss:$8 sps:$4 sm:$0xff]   ;;  %v5780_v24 = vld [vmem:[%s7167_s16 + $0x50] ss:$8 sps:$4 sm:$0xff]  }
  0xde   : > { %3913 = vmatpush1.bf16.msra.mxu0 %v5757_v9  ;;  %3627 = vmatprep.subr.bf16.mxu1 %v5758_v10  ;;  %v5775_v21 = vld [vmem:[%s7167_s16 + $0x740] ss:$8 sps:$4 sm:$0xff]   ;;  %v5778_v23 = vld [vmem:[%s7167_s16 + $0x754] ss:$8 sps:$4 sm:$0xff]   ;;  %v5781_v25 = vld [vmem:[%s7167_s16 + $0x750] ss:$8 sps:$4 sm:$0xff]  }
  0xdf   : > { %3914 = vmatprep.subr.bf16.mxu0 %v5760_v11  ;;  %v5782_v26 = vld [vmem:[%s7167_s16 + $0x64] ss:$8 sps:$4 sm:$0xff]   ;;  %v5786_v28 = vld [vmem:[%s7167_s16 + $0x60] ss:$8 sps:$4 sm:$0xff]   ;;  %v5788_v30 = vld [vmem:[%s7167_s16 + $0x74] ss:$8 sps:$4 sm:$0xff]  }
  0xe0   : > { %v5784_v27 = vld [vmem:[%s7167_s16 + $0x764] ss:$8 sps:$4 sm:$0xff]   ;;  %v5787_v29 = vld [vmem:[%s7167_s16 + $0x760] ss:$8 sps:$4 sm:$0xff]   ;;  %v5790_v31 = vld [vmem:[%s7167_s16 + $0x774] ss:$8 sps:$4 sm:$0xff]  }
  0xe1   : > { %3628 = vmatpush1.bf16.msra.mxu1 %v5762_v12  ;;  %v5792_v32 = vld [vmem:[%s7167_s16 + $0x70] ss:$8 sps:$4 sm:$0xff]   ;;  %v5794_v34 = vld [vmem:[%s7167_s16 + $0x84] ss:$8 sps:$4 sm:$0xff]   ;;  %v5798_v36 = vld [vmem:[%s7167_s16 + $0x80] ss:$8 sps:$4 sm:$0xff]  }
  0xe2   : > { %3915 = vmatpush1.bf16.msra.mxu0 %v5763_v13  ;;  %3629 = vmatprep.subr.bf16.mxu1 %v5764_v14  ;;  %v5793_v33 = vld [vmem:[%s7167_s16 + $0x770] ss:$8 sps:$4 sm:$0xff]   ;;  %v5796_v35 = vld [vmem:[%s7167_s16 + $0x784] ss:$8 sps:$4 sm:$0xff]   ;;  %v5799_v37 = vld [vmem:[%s7167_s16 + $0x780] ss:$8 sps:$4 sm:$0xff]  }
  0xe3   : > { %3916 = vmatprep.subr.bf16.mxu0 %v5766_v15  ;;  %v5800_v38 = vld [vmem:[%s7167_s16 + $0x94] ss:$8 sps:$4 sm:$0xff]   ;;  %v5804_v40 = vld [vmem:[%s7167_s16 + $0x90] ss:$8 sps:$4 sm:$0xff]   ;;  %v5806_v42 = vld [vmem:[%s7167_s16 + $0xa4] ss:$8 sps:$4 sm:$0xff]  }
  0xe4   : > { %v5802_v39 = vld [vmem:[%s7167_s16 + $0x794] ss:$8 sps:$4 sm:$0xff]   ;;  %v5805_v41 = vld [vmem:[%s7167_s16 + $0x790] ss:$8 sps:$4 sm:$0xff]   ;;  %v5808_v43 = vld [vmem:[%s7167_s16 + $0x7a4] ss:$8 sps:$4 sm:$0xff]  }
  0xe5   : > { %3630 = vmatpush1.bf16.msra.mxu1 %v5768_v16  ;;  %v5810_v44 = vld [vmem:[%s7167_s16 + $0xa0] ss:$8 sps:$4 sm:$0xff]   ;;  %v5812_v46 = vld [vmem:[%s7167_s16 + $0xb4] ss:$8 sps:$4 sm:$0xff]   ;;  %v5816_v49 = vld [vmem:[%s7167_s16 + $0xb0] ss:$8 sps:$4 sm:$0xff]  }
  0xe6   : > { %3917 = vmatpush1.bf16.msra.mxu0 %v5769_v17  ;;  %3631 = vmatprep.subr.bf16.mxu1 %v5770_v18  ;;  %v5811_v45 = vld [vmem:[%s7167_s16 + $0x7a0] ss:$8 sps:$4 sm:$0xff]   ;;  %v5814_v47 = vld [vmem:[%s7167_s16 + $0x7b4] ss:$8 sps:$4 sm:$0xff]   ;;  %v5817_v51 = vld [vmem:[%s7167_s16 + $0x7b0] ss:$8 sps:$4 sm:$0xff]  }
  0xe7   : > { %3918 = vmatprep.subr.bf16.mxu0 %v5772_v19  ;;  %v411_v48 = vld [vmem:[#allocation4] sm:$0xff]  ;;  %v418_v52 = vld [vmem:[#allocation4 + $0x38] sm:$0xff]  ;;  %p5591_p4 = scmp.ne.s32.totalorder %s6946_s6, 7 }
  0xe8   : > { %v4984_v50 = vcombine.high %v411_v48, %v411_v48  ;;  %v5818_v53 = vld [vmem:[%s7167_s16 + $0xc4] ss:$8 sps:$4 sm:$0xff]   ;;  %v4998_v55 = vcombine.high %v418_v52, %v418_v52  ;;  %v5822_v56 = vld [vmem:[%s7167_s16 + $0xc0] ss:$8 sps:$4 sm:$0xff]   ;;  %v5824_v58 = vld [vmem:[%s7167_s16 + $0xd4] ss:$8 sps:$4 sm:$0xff]   ;;  %v4983_v8 = vcombine.low %v411_v48, %v411_v48  ;;  %v4997_v9 = vcombine.low %v418_v52, %v418_v52 }
  0xe9   : > { %3632 = vmatpush1.bf16.msra.mxu1 %v5774_v20  ;;  %v5820_v54 = vld [vmem:[%s7167_s16 + $0x7c4] ss:$8 sps:$4 sm:$0xff]   ;;  %v5823_v57 = vld [vmem:[%s7167_s16 + $0x7c0] ss:$8 sps:$4 sm:$0xff]   ;;  %v5826_v59 = vld [vmem:[%s7167_s16 + $0x7d4] ss:$8 sps:$4 sm:$0xff]  }
  0xea   : > { %3919 = vmatpush1.bf16.msra.mxu0 %v5775_v21  ;;  %3633 = vmatprep.subr.bf16.mxu1 %v5776_v22  ;;  %v5828_v60 = vld [vmem:[%s7167_s16 + $0xd0] ss:$8 sps:$4 sm:$0xff]   ;;  %v5830_v62 = vld [vmem:[%s7167_s16 + $0xe4] ss:$8 sps:$4 sm:$0xff]   ;;  %v5834_v0 = vld [vmem:[%s7167_s16 + $0xe0] ss:$8 sps:$4 sm:$0xff]  }
  0xeb   : > { %3920 = vmatprep.subr.bf16.mxu0 %v5778_v23  ;;  %3655 = vmatprep.mubr.bf16.mxu1 %v4984_v50  ;;  %v5829_v61 = vld [vmem:[%s7167_s16 + $0x7d0] ss:$8 sps:$4 sm:$0xff]   ;;  %v5832_v63 = vld [vmem:[%s7167_s16 + $0x7e4] ss:$8 sps:$4 sm:$0xff]   ;;  %v5835_v1 = vld [vmem:[%s7167_s16 + $0x7e0] ss:$8 sps:$4 sm:$0xff]  }
  0xec   : > { %3942 = vmatprep.mubr.bf16.mxu0 %v4998_v55  ;;  %v5836_v2 = vld [vmem:[%s7167_s16 + $0xf4] ss:$8 sps:$4 sm:$0xff]   ;;  %v5840_v4 = vld [vmem:[%s7167_s16 + $0xf0] ss:$8 sps:$4 sm:$0xff]   ;;  %v5846_v6 = vld [vmem:[%s7167_s16 + $0x104] ss:$8 sps:$4 sm:$0xff]  }
  0xed   : > { %3634 = vmatpush1.bf16.msra.mxu1 %v5780_v24  ;;  %v5838_v3 = vld [vmem:[%s7167_s16 + $0x7f4] ss:$8 sps:$4 sm:$0xff]   ;;  %v5841_v5 = vld [vmem:[%s7167_s16 + $0x7f0] ss:$8 sps:$4 sm:$0xff]   ;;  %v5851_v7 = vld [vmem:[%s7167_s16 + $0x804] ss:$8 sps:$4 sm:$0xff]  }
  0xee   : > { %3921 = vmatpush1.bf16.msra.mxu0 %v5781_v25  ;;  %3635 = vmatprep.subr.bf16.mxu1 %v5782_v26  ;;  %v5844_v10 = vld [vmem:[%s7167_s16 + $0x100] ss:$8 sps:$4 sm:$0xff]   ;;  %v5854_v12 = vld [vmem:[%s7167_s16 + $0x114] ss:$8 sps:$4 sm:$0xff]   ;;  %v5852_v14 = vld [vmem:[%s7167_s16 + $0x110] ss:$8 sps:$4 sm:$0xff]  }
  0xef   : > { %3922 = vmatprep.subr.bf16.mxu0 %v5784_v27  ;;  %v5849_v11 = vld [vmem:[%s7167_s16 + $0x800] ss:$8 sps:$4 sm:$0xff]   ;;  %v5857_v13 = vld [vmem:[%s7167_s16 + $0x814] ss:$8 sps:$4 sm:$0xff]   ;;  %v5855_v15 = vld [vmem:[%s7167_s16 + $0x810] ss:$8 sps:$4 sm:$0xff]  }
  0xf0   : > { %v5860_v16 = vld [vmem:[%s7167_s16 + $0x124] ss:$8 sps:$4 sm:$0xff]   ;;  %v5858_v18 = vld [vmem:[%s7167_s16 + $0x120] ss:$8 sps:$4 sm:$0xff]   ;;  %v5866_v20 = vld [vmem:[%s7167_s16 + $0x134] ss:$8 sps:$4 sm:$0xff]  }
  0xf1   : > { %3636 = vmatpush1.bf16.msra.mxu1 %v5786_v28  ;;  %v5863_v17 = vld [vmem:[%s7167_s16 + $0x824] ss:$8 sps:$4 sm:$0xff]   ;;  %v5861_v19 = vld [vmem:[%s7167_s16 + $0x820] ss:$8 sps:$4 sm:$0xff]   ;;  %v5869_v21 = vld [vmem:[%s7167_s16 + $0x834] ss:$8 sps:$4 sm:$0xff]  }
  0xf2   : > { %3923 = vmatpush1.bf16.msra.mxu0 %v5787_v29  ;;  %3637 = vmatprep.subr.bf16.mxu1 %v5788_v30  ;;  %v5864_v22 = vld [vmem:[%s7167_s16 + $0x130] ss:$8 sps:$4 sm:$0xff]   ;;  %v5872_v24 = vld [vmem:[%s7167_s16 + $0x144] ss:$8 sps:$4 sm:$0xff]   ;;  %v5870_v26 = vld [vmem:[%s7167_s16 + $0x140] ss:$8 sps:$4 sm:$0xff]  }
  0xf3   : > { %3924 = vmatprep.subr.bf16.mxu0 %v5790_v31  ;;  %v5867_v23 = vld [vmem:[%s7167_s16 + $0x830] ss:$8 sps:$4 sm:$0xff]   ;;  %v5875_v25 = vld [vmem:[%s7167_s16 + $0x844] ss:$8 sps:$4 sm:$0xff]   ;;  %v5873_v27 = vld [vmem:[%s7167_s16 + $0x840] ss:$8 sps:$4 sm:$0xff]  }
  0xf4   : > { %v5878_v28 = vld [vmem:[%s7167_s16 + $0x154] ss:$8 sps:$4 sm:$0xff]   ;;  %v5876_v30 = vld [vmem:[%s7167_s16 + $0x150] ss:$8 sps:$4 sm:$0xff]   ;;  %v5908_v52 = vld [vmem:[%s7167_s16 + $0x1a4] ss:$8 sps:$4 sm:$0xff]  }
  0xf5   : > { %3638 = vmatpush1.bf16.msra.mxu1 %v5792_v32  ;;  %v5881_v29 = vld [vmem:[%s7167_s16 + $0x854] ss:$8 sps:$4 sm:$0xff]   ;;  %v5879_v31 = vld [vmem:[%s7167_s16 + $0x850] ss:$8 sps:$4 sm:$0xff]   ;;  %v5884_v32 = vld [vmem:[%s7167_s16 + $0x164] ss:$8 sps:$4 sm:$0xff]  }
  0xf6   : > { %3925 = vmatpush1.bf16.msra.mxu0 %v5793_v33  ;;  %3639 = vmatprep.subr.bf16.mxu1 %v5794_v34  ;;  %v5887_v33 = vld [vmem:[%s7167_s16 + $0x864] ss:$8 sps:$4 sm:$0xff]   ;;  %v5902_v48 = vld [vmem:[%s7167_s16 + $0x194] ss:$8 sps:$4 sm:$0xff]   ;;  %v5900_v50 = vld [vmem:[%s7167_s16 + $0x190] ss:$8 sps:$4 sm:$0xff]  }
  0xf7   : > { %3926 = vmatprep.subr.bf16.mxu0 %v5796_v35  ;;  %v7281_v34 = vld [vmem:[#allocation4 + $0x8] sm:$0xff]  ;;  %vm4844_vm0 = vcmask (!%p5591_p4), 7168   ;;  %s7942_s24 = sld [smem:[#allocation24_spill]] (!%p5591_p4) }
  0xf8   : > { %v5882_v35 = vld [vmem:[%s7167_s16 + $0x160] ss:$8 sps:$4 sm:$0xff]  }
  0xf9   : > { %3640 = vmatpush1.bf16.msra.mxu1 %v5798_v36  ;;  %v5885_v36 = vld [vmem:[%s7167_s16 + $0x860] ss:$8 sps:$4 sm:$0xff]  }
  0xfa   : > { %3927 = vmatpush1.bf16.msra.mxu0 %v5799_v37  ;;  %3641 = vmatprep.subr.bf16.mxu1 %v5800_v38  ;;  %v4986_v37 = vcombine.high %v7281_v34, %v7281_v34  ;;  %v7287_v38 = vld [vmem:[#allocation4 + $0x40] sm:$0xff] }
  0xfb   : > { %3928 = vmatprep.subr.bf16.mxu0 %v5802_v39  ;;  %v5890_v39 = vld [vmem:[%s7167_s16 + $0x174] ss:$8 sps:$4 sm:$0xff]   ;;  %v5909_v55 = vld [vmem:[%s7167_s16 + $0x8a0] ss:$8 sps:$4 sm:$0xff]  }
  0xfd   : > { %3642 = vmatpush1.bf16.msra.mxu1 %v5804_v40  ;;  %v5000_v40 = vcombine.high %v7287_v38, %v7287_v38 }
  0xfe   : > { %3929 = vmatpush1.bf16.msra.mxu0 %v5805_v41  ;;  %3643 = vmatprep.subr.bf16.mxu1 %v5806_v42  ;;  %v5893_v41 = vld [vmem:[%s7167_s16 + $0x874] ss:$8 sps:$4 sm:$0xff]   ;;  %v5888_v42 = vld [vmem:[%s7167_s16 + $0x170] ss:$8 sps:$4 sm:$0xff]  }
  0xff   : > { %3930 = vmatprep.subr.bf16.mxu0 %v5808_v43  ;;  %v5891_v43 = vld [vmem:[%s7167_s16 + $0x870] ss:$8 sps:$4 sm:$0xff]  }
 0x101   : > { %3644 = vmatpush1.bf16.msra.mxu1 %v5810_v44  ;;  %v5896_v44 = vld [vmem:[%s7167_s16 + $0x184] ss:$8 sps:$4 sm:$0xff]  }
 0x102   : > { %3931 = vmatpush1.bf16.msra.mxu0 %v5811_v45  ;;  %3645 = vmatprep.subr.bf16.mxu1 %v5812_v46  ;;  %v5899_v45 = vld [vmem:[%s7167_s16 + $0x884] ss:$8 sps:$4 sm:$0xff]   ;;  %v5894_v46 = vld [vmem:[%s7167_s16 + $0x180] ss:$8 sps:$4 sm:$0xff]  }
 0x103   : > { %3932 = vmatprep.subr.bf16.mxu0 %v5814_v47  ;;  %v5897_v47 = vld [vmem:[%s7167_s16 + $0x880] ss:$8 sps:$4 sm:$0xff]  }
 0x105   : > { %3646 = vmatpush1.bf16.msra.mxu1 %v5816_v49  ;;  %v5905_v49 = vld [vmem:[%s7167_s16 + $0x894] ss:$8 sps:$4 sm:$0xff]  }
 0x106   : > { %3933 = vmatpush1.bf16.msra.mxu0 %v5817_v51  ;;  %3647 = vmatprep.subr.bf16.mxu1 %v5818_v53  ;;  %v5903_v51 = vld [vmem:[%s7167_s16 + $0x890] ss:$8 sps:$4 sm:$0xff]   ;;  %v5911_v53 = vld [vmem:[%s7167_s16 + $0x8a4] ss:$8 sps:$4 sm:$0xff]  }
 0x107   : > { %3934 = vmatprep.subr.bf16.mxu0 %v5820_v54  ;;  %v5906_v54 = vld [vmem:[%s7167_s16 + $0x1a0] ss:$8 sps:$4 sm:$0xff]  }
 0x109   : > { %3648 = vmatpush1.bf16.msra.mxu1 %v5822_v56  ;;  %v5914_v56 = vld [vmem:[%s7167_s16 + $0x1b4] ss:$8 sps:$4 sm:$0xff]  }
 0x10a   : > { %3935 = vmatpush1.bf16.msra.mxu0 %v5823_v57  ;;  %3649 = vmatprep.subr.bf16.mxu1 %v5824_v58  ;;  %v5917_v57 = vld [vmem:[%s7167_s16 + $0x8b4] ss:$8 sps:$4 sm:$0xff]   ;;  %v5912_v58 = vld [vmem:[%s7167_s16 + $0x1b0] ss:$8 sps:$4 sm:$0xff]  }
 0x10b   : > { %3936 = vmatprep.subr.bf16.mxu0 %v5826_v59  ;;  %v5915_v59 = vld [vmem:[%s7167_s16 + $0x8b0] ss:$8 sps:$4 sm:$0xff]  }
 0x10d   : > { %3650 = vmatpush1.bf16.msra.mxu1 %v5828_v60  ;;  %v5920_v60 = vld [vmem:[%s7167_s16 + $0x1c4] ss:$8 sps:$4 sm:$0xff]  }
 0x10e   : > { %3937 = vmatpush1.bf16.msra.mxu0 %v5829_v61  ;;  %3651 = vmatprep.subr.bf16.mxu1 %v5830_v62  ;;  %v5923_v61 = vld [vmem:[%s7167_s16 + $0x8c4] ss:$8 sps:$4 sm:$0xff]   ;;  %v5918_v62 = vld [vmem:[%s7167_s16 + $0x1c0] ss:$8 sps:$4 sm:$0xff]  }
 0x10f   : > { %3938 = vmatprep.subr.bf16.mxu0 %v5832_v63  ;;  %v5921_v63 = vld [vmem:[%s7167_s16 + $0x8c0] ss:$8 sps:$4 sm:$0xff]  }
 0x111   : > { %3652 = vmatpush1.bf16.msra.mxu1 %v5834_v0  ;;  %v5926_v0 = vld [vmem:[%s7167_s16 + $0x1d4] ss:$8 sps:$4 sm:$0xff]  }
 0x112   : > { %3939 = vmatpush1.bf16.msra.mxu0 %v5835_v1  ;;  %3653 = vmatprep.subr.bf16.mxu1 %v5836_v2  ;;  %v5929_v1 = vld [vmem:[%s7167_s16 + $0x8d4] ss:$8 sps:$4 sm:$0xff]   ;;  %v5924_v2 = vld [vmem:[%s7167_s16 + $0x1d0] ss:$8 sps:$4 sm:$0xff]  }
 0x113   : > { %3940 = vmatprep.subr.bf16.mxu0 %v5838_v3  ;;  %v5927_v3 = vld [vmem:[%s7167_s16 + $0x8d0] ss:$8 sps:$4 sm:$0xff]  }
 0x115   : > { %3654 = vmatpush1.bf16.msra.mxu1 %v5840_v4  ;;  %v5932_v4 = vld [vmem:[%s7167_s16 + $0x1e4] ss:$8 sps:$4 sm:$0xff]  }
 0x116   : > { %3941 = vmatpush1.bf16.msra.mxu0 %v5841_v5  ;;  %3664 = vmatprep.subr.bf16.mxu1 %v5846_v6  ;;  %v5935_v5 = vld [vmem:[%s7167_s16 + $0x8e4] ss:$8 sps:$4 sm:$0xff]   ;;  %v5930_v6 = vld [vmem:[%s7167_s16 + $0x1e0] ss:$8 sps:$4 sm:$0xff]  }
 0x117   : > { %3951 = vmatprep.subr.bf16.mxu0 %v5851_v7  ;;  %v5933_v7 = vld [vmem:[%s7167_s16 + $0x8e0] ss:$8 sps:$4 sm:$0xff]  }
 0x118   : > { %3656 = vmatmul.mubr.bf16.vlgmr.msra.gmra.mrb[0].mxu1 %v4983_v8  ;;  %v5938_v8 = vld [vmem:[%s7167_s16 + $0x1f4] ss:$8 sps:$4 sm:$0xff]  }
 0x119   : > { %3943 = vmatmul.mubr.bf16.vlgmr.msra.gmra.mrb[0].mxu0 %v4997_v9  ;;  %3665 = vmatpush1.bf16.msra.mxu1 %v5844_v10  ;;  %v5941_v9 = vld [vmem:[%s7167_s16 + $0x8f4] ss:$8 sps:$4 sm:$0xff]   ;;  %v5936_v10 = vld [vmem:[%s7167_s16 + $0x1f0] ss:$8 sps:$4 sm:$0xff]  }
 0x11a   : > { %3952 = vmatpush1.bf16.msra.mxu0 %v5849_v11  ;;  %3666 = vmatprep.subr.bf16.mxu1 %v5854_v12  ;;  %v5939_v11 = vld [vmem:[%s7167_s16 + $0x8f0] ss:$8 sps:$4 sm:$0xff]   ;;  %v5946_v12 = vld [vmem:[%s7167_s16 + $0x204] ss:$8 sps:$4 sm:$0xff]  }
 0x11b   : > { %3953 = vmatprep.subr.bf16.mxu0 %v5857_v13  ;;  %3696 = vmatprep.mubr.bf16.mxu1 %v4986_v37  ;;  %v5951_v13 = vld [vmem:[%s7167_s16 + $0x904] ss:$8 sps:$4 sm:$0xff]   ;;  %v5973_v37 = vld [vmem:[%s7167_s16 + $0x940] ss:$8 sps:$4 sm:$0xff]  }
 0x11c   : > { %3983 = vmatprep.mubr.bf16.mxu0 %v5000_v40  ;;  %v5976_v40 = vld [vmem:[%s7167_s16 + $0x250] ss:$8 sps:$4 sm:$0xff]  }
 0x11d   : > { %3667 = vmatpush1.bf16.msra.mxu1 %v5852_v14  ;;  %v4985_v14 = vcombine.low %v7281_v34, %v7281_v34  ;;  %v5972_v34 = vld [vmem:[%s7167_s16 + $0x244] ss:$8 sps:$4 sm:$0xff]  }
 0x11e   : > { %3954 = vmatpush1.bf16.msra.mxu0 %v5855_v15  ;;  %3668 = vmatprep.subr.bf16.mxu1 %v5860_v16  ;;  %v5944_v15 = vld [vmem:[%s7167_s16 + $0x200] ss:$8 sps:$4 sm:$0xff]   ;;  %v4999_v16 = vcombine.low %v7287_v38, %v7287_v38  ;;  %v5978_v38 = vld [vmem:[%s7167_s16 + $0x254] ss:$8 sps:$4 sm:$0xff]  }
 0x11f   : > { %3955 = vmatprep.subr.bf16.mxu0 %v5863_v17  ;;  %v5949_v17 = vld [vmem:[%s7167_s16 + $0x900] ss:$8 sps:$4 sm:$0xff]  }
 0x121   : > { %3669 = vmatpush1.bf16.msra.mxu1 %v5858_v18  ;;  %v5954_v18 = vld [vmem:[%s7167_s16 + $0x214] ss:$8 sps:$4 sm:$0xff]  }
 0x122   : > { %3956 = vmatpush1.bf16.msra.mxu0 %v5861_v19  ;;  %3670 = vmatprep.subr.bf16.mxu1 %v5866_v20  ;;  %v5957_v19 = vld [vmem:[%s7167_s16 + $0x914] ss:$8 sps:$4 sm:$0xff]  }
 0x123   : > { %3957 = vmatprep.subr.bf16.mxu0 %v5869_v21  ;;  %v7337_v20 = vld [vmem:[#allocation4 + $0x10] sm:$0xff] }
 0x124   : > { %v4988_v21 = vcombine.high %v7337_v20, %v7337_v20 }
 0x125   : > { %3671 = vmatpush1.bf16.msra.mxu1 %v5864_v22  ;;  %v7341_v22 = vld [vmem:[#allocation4 + $0x48] sm:$0xff] }
 0x126   : > { %3958 = vmatpush1.bf16.msra.mxu0 %v5867_v23  ;;  %3672 = vmatprep.subr.bf16.mxu1 %v5872_v24  ;;  %v5952_v23 = vld [vmem:[%s7167_s16 + $0x210] ss:$8 sps:$4 sm:$0xff]  }
 0x127   : > { %3959 = vmatprep.subr.bf16.mxu0 %v5875_v25  ;;  %v5955_v24 = vld [vmem:[%s7167_s16 + $0x910] ss:$8 sps:$4 sm:$0xff]   ;;  %v5002_v25 = vcombine.high %v7341_v22, %v7341_v22 }
 0x129   : > { %3673 = vmatpush1.bf16.msra.mxu1 %v5870_v26  ;;  %v5960_v26 = vld [vmem:[%s7167_s16 + $0x224] ss:$8 sps:$4 sm:$0xff]  }
 0x12a   : > { %3960 = vmatpush1.bf16.msra.mxu0 %v5873_v27  ;;  %3674 = vmatprep.subr.bf16.mxu1 %v5878_v28  ;;  %v5963_v27 = vld [vmem:[%s7167_s16 + $0x924] ss:$8 sps:$4 sm:$0xff]   ;;  %v5958_v28 = vld [vmem:[%s7167_s16 + $0x220] ss:$8 sps:$4 sm:$0xff]  }
 0x12b   : > { %3961 = vmatprep.subr.bf16.mxu0 %v5881_v29  ;;  %v5961_v29 = vld [vmem:[%s7167_s16 + $0x920] ss:$8 sps:$4 sm:$0xff]  }
 0x12d   : > { %3675 = vmatpush1.bf16.msra.mxu1 %v5876_v30  ;;  %v5966_v30 = vld [vmem:[%s7167_s16 + $0x234] ss:$8 sps:$4 sm:$0xff]  }
 0x12e   : > { %3962 = vmatpush1.bf16.msra.mxu0 %v5879_v31  ;;  %3676 = vmatprep.subr.bf16.mxu1 %v5884_v32  ;;  %v5969_v31 = vld [vmem:[%s7167_s16 + $0x934] ss:$8 sps:$4 sm:$0xff]   ;;  %v5964_v32 = vld [vmem:[%s7167_s16 + $0x230] ss:$8 sps:$4 sm:$0xff]  }
 0x12f   : > { %3963 = vmatprep.subr.bf16.mxu0 %v5887_v33  ;;  %v5967_v33 = vld [vmem:[%s7167_s16 + $0x930] ss:$8 sps:$4 sm:$0xff]  }
 0x131   : > { %3677 = vmatpush1.bf16.msra.mxu1 %v5882_v35  ;;  %v5975_v35 = vld [vmem:[%s7167_s16 + $0x944] ss:$8 sps:$4 sm:$0xff]  }
 0x132   : > { %3964 = vmatpush1.bf16.msra.mxu0 %v5885_v36  ;;  %3678 = vmatprep.subr.bf16.mxu1 %v5890_v39  ;;  %v5970_v36 = vld [vmem:[%s7167_s16 + $0x240] ss:$8 sps:$4 sm:$0xff]   ;;  %v5981_v39 = vld [vmem:[%s7167_s16 + $0x954] ss:$8 sps:$4 sm:$0xff]  }
 0x133   : > { %3965 = vmatprep.subr.bf16.mxu0 %v5893_v41  ;;  %v5979_v41 = vld [vmem:[%s7167_s16 + $0x950] ss:$8 sps:$4 sm:$0xff]  }
 0x135   : > { %3679 = vmatpush1.bf16.msra.mxu1 %v5888_v42  ;;  %v5984_v42 = vld [vmem:[%s7167_s16 + $0x264] ss:$8 sps:$4 sm:$0xff]  }
 0x136   : > { %3966 = vmatpush1.bf16.msra.mxu0 %v5891_v43  ;;  %3680 = vmatprep.subr.bf16.mxu1 %v5896_v44  ;;  %v5987_v43 = vld [vmem:[%s7167_s16 + $0x964] ss:$8 sps:$4 sm:$0xff]   ;;  %v5982_v44 = vld [vmem:[%s7167_s16 + $0x260] ss:$8 sps:$4 sm:$0xff]  }
 0x137   : > { %3967 = vmatprep.subr.bf16.mxu0 %v5899_v45  ;;  %v5985_v45 = vld [vmem:[%s7167_s16 + $0x960] ss:$8 sps:$4 sm:$0xff]  }
 0x139   : > { %3681 = vmatpush1.bf16.msra.mxu1 %v5894_v46  ;;  %v5990_v46 = vld [vmem:[%s7167_s16 + $0x274] ss:$8 sps:$4 sm:$0xff]  }
 0x13a   : > { %3968 = vmatpush1.bf16.msra.mxu0 %v5897_v47  ;;  %3682 = vmatprep.subr.bf16.mxu1 %v5902_v48  ;;  %v5993_v47 = vld [vmem:[%s7167_s16 + $0x974] ss:$8 sps:$4 sm:$0xff]   ;;  %v5988_v48 = vld [vmem:[%s7167_s16 + $0x270] ss:$8 sps:$4 sm:$0xff]  }
 0x13b   : > { %3969 = vmatprep.subr.bf16.mxu0 %v5905_v49  ;;  %v5991_v49 = vld [vmem:[%s7167_s16 + $0x970] ss:$8 sps:$4 sm:$0xff]  }
 0x13d   : > { %3683 = vmatpush1.bf16.msra.mxu1 %v5900_v50  ;;  %v5996_v50 = vld [vmem:[%s7167_s16 + $0x284] ss:$8 sps:$4 sm:$0xff]  }
 0x13e   : > { %3970 = vmatpush1.bf16.msra.mxu0 %v5903_v51  ;;  %3684 = vmatprep.subr.bf16.mxu1 %v5908_v52  ;;  %v5999_v51 = vld [vmem:[%s7167_s16 + $0x984] ss:$8 sps:$4 sm:$0xff]   ;;  %v5994_v52 = vld [vmem:[%s7167_s16 + $0x280] ss:$8 sps:$4 sm:$0xff]  }
 0x13f   : > { %3971 = vmatprep.subr.bf16.mxu0 %v5911_v53  ;;  %v5997_v53 = vld [vmem:[%s7167_s16 + $0x980] ss:$8 sps:$4 sm:$0xff]  }
 0x141   : > { %3685 = vmatpush1.bf16.msra.mxu1 %v5906_v54  ;;  %v6002_v54 = vld [vmem:[%s7167_s16 + $0x294] ss:$8 sps:$4 sm:$0xff]  }
 0x142   : > { %3972 = vmatpush1.bf16.msra.mxu0 %v5909_v55  ;;  %3686 = vmatprep.subr.bf16.mxu1 %v5914_v56  ;;  %v6005_v55 = vld [vmem:[%s7167_s16 + $0x994] ss:$8 sps:$4 sm:$0xff]   ;;  %v6000_v56 = vld [vmem:[%s7167_s16 + $0x290] ss:$8 sps:$4 sm:$0xff]  }
 0x143   : > { %3973 = vmatprep.subr.bf16.mxu0 %v5917_v57  ;;  %v6003_v57 = vld [vmem:[%s7167_s16 + $0x990] ss:$8 sps:$4 sm:$0xff]  }
 0x145   : > { %3687 = vmatpush1.bf16.msra.mxu1 %v5912_v58  ;;  %v6008_v58 = vld [vmem:[%s7167_s16 + $0x2a4] ss:$8 sps:$4 sm:$0xff]  }
 0x146   : > { %3974 = vmatpush1.bf16.msra.mxu0 %v5915_v59  ;;  %3688 = vmatprep.subr.bf16.mxu1 %v5920_v60  ;;  %v6011_v59 = vld [vmem:[%s7167_s16 + $0x9a4] ss:$8 sps:$4 sm:$0xff]   ;;  %v6006_v60 = vld [vmem:[%s7167_s16 + $0x2a0] ss:$8 sps:$4 sm:$0xff]  }
 0x147   : > { %3975 = vmatprep.subr.bf16.mxu0 %v5923_v61  ;;  %v6009_v61 = vld [vmem:[%s7167_s16 + $0x9a0] ss:$8 sps:$4 sm:$0xff]  }
 0x149   : > { %3689 = vmatpush1.bf16.msra.mxu1 %v5918_v62  ;;  %v6014_v62 = vld [vmem:[%s7167_s16 + $0x2b4] ss:$8 sps:$4 sm:$0xff]  }
 0x14a   : > { %3976 = vmatpush1.bf16.msra.mxu0 %v5921_v63  ;;  %3690 = vmatprep.subr.bf16.mxu1 %v5926_v0  ;;  %v6017_v63 = vld [vmem:[%s7167_s16 + $0x9b4] ss:$8 sps:$4 sm:$0xff]   ;;  %v6012_v0 = vld [vmem:[%s7167_s16 + $0x2b0] ss:$8 sps:$4 sm:$0xff]  }
 0x14b   : > { %3977 = vmatprep.subr.bf16.mxu0 %v5929_v1  ;;  %v6015_v1 = vld [vmem:[%s7167_s16 + $0x9b0] ss:$8 sps:$4 sm:$0xff]  }
 0x14d   : > { %3691 = vmatpush1.bf16.msra.mxu1 %v5924_v2  ;;  %v6020_v2 = vld [vmem:[%s7167_s16 + $0x2c4] ss:$8 sps:$4 sm:$0xff]  }
 0x14e   : > { %3978 = vmatpush1.bf16.msra.mxu0 %v5927_v3  ;;  %3692 = vmatprep.subr.bf16.mxu1 %v5932_v4  ;;  %v6023_v3 = vld [vmem:[%s7167_s16 + $0x9c4] ss:$8 sps:$4 sm:$0xff]   ;;  %v6018_v4 = vld [vmem:[%s7167_s16 + $0x2c0] ss:$8 sps:$4 sm:$0xff]  }
 0x14f   : > { %3979 = vmatprep.subr.bf16.mxu0 %v5935_v5  ;;  %v6021_v5 = vld [vmem:[%s7167_s16 + $0x9c0] ss:$8 sps:$4 sm:$0xff]  }
 0x151   : > { %3693 = vmatpush1.bf16.msra.mxu1 %v5930_v6  ;;  %v6026_v6 = vld [vmem:[%s7167_s16 + $0x2d4] ss:$8 sps:$4 sm:$0xff]  }
 0x152   : > { %3980 = vmatpush1.bf16.msra.mxu0 %v5933_v7  ;;  %3694 = vmatprep.subr.bf16.mxu1 %v5938_v8  ;;  %v6029_v7 = vld [vmem:[%s7167_s16 + $0x9d4] ss:$8 sps:$4 sm:$0xff]   ;;  %v6024_v8 = vld [vmem:[%s7167_s16 + $0x2d0] ss:$8 sps:$4 sm:$0xff]  }
 0x153   : > { %3981 = vmatprep.subr.bf16.mxu0 %v5941_v9  ;;  %v6027_v9 = vld [vmem:[%s7167_s16 + $0x9d0] ss:$8 sps:$4 sm:$0xff]  }
 0x155   : > { %3695 = vmatpush1.bf16.msra.mxu1 %v5936_v10  ;;  %v6032_v10 = vld [vmem:[%s7167_s16 + $0x2e4] ss:$8 sps:$4 sm:$0xff]  }
 0x156   : > { %3982 = vmatpush1.bf16.msra.mxu0 %v5939_v11  ;;  %3705 = vmatprep.subr.bf16.mxu1 %v5946_v12  ;;  %v6035_v11 = vld [vmem:[%s7167_s16 + $0x9e4] ss:$8 sps:$4 sm:$0xff]   ;;  %v6030_v12 = vld [vmem:[%s7167_s16 + $0x2e0] ss:$8 sps:$4 sm:$0xff]  }
 0x157   : > { %3992 = vmatprep.subr.bf16.mxu0 %v5951_v13  ;;  %v6033_v13 = vld [vmem:[%s7167_s16 + $0x9e0] ss:$8 sps:$4 sm:$0xff]  }
 0x158   : > { %3697 = vmatmul.mubr.bf16.vlgmr.msra.gmra.mrb[0].mxu1 %v4985_v14  ;;  %v6038_v14 = vld [vmem:[%s7167_s16 + $0x2f4] ss:$8 sps:$4 sm:$0xff]  }
 0x159   : > { %3984 = vmatmul.mubr.bf16.vlgmr.msra.gmra.mrb[0].mxu0 %v4999_v16  ;;  %3706 = vmatpush1.bf16.msra.mxu1 %v5944_v15  ;;  %v6041_v15 = vld [vmem:[%s7167_s16 + $0x9f4] ss:$8 sps:$4 sm:$0xff]   ;;  %v6036_v16 = vld [vmem:[%s7167_s16 + $0x2f0] ss:$8 sps:$4 sm:$0xff]  }
 0x15a   : > { %3993 = vmatpush1.bf16.msra.mxu0 %v5949_v17  ;;  %3707 = vmatprep.subr.bf16.mxu1 %v5954_v18  ;;  %v6039_v17 = vld [vmem:[%s7167_s16 + $0x9f0] ss:$8 sps:$4 sm:$0xff]   ;;  %v6046_v18 = vld [vmem:[%s7167_s16 + $0x304] ss:$8 sps:$4 sm:$0xff]  }
 0x15b   : > { %3994 = vmatprep.subr.bf16.mxu0 %v5957_v19  ;;  %3737 = vmatprep.mubr.bf16.mxu1 %v4988_v21  ;;  %v6051_v19 = vld [vmem:[%s7167_s16 + $0xa04] ss:$8 sps:$4 sm:$0xff]   ;;  %v6044_v21 = vld [vmem:[%s7167_s16 + $0x300] ss:$8 sps:$4 sm:$0xff]  }
 0x15c   : > { %4024 = vmatprep.mubr.bf16.mxu0 %v5002_v25  ;;  %v5001_v25 = vcombine.low %v7341_v22, %v7341_v22 }
 0x15d   : > { %3708 = vmatpush1.bf16.msra.mxu1 %v5952_v23  ;;  %v6049_v23 = vld [vmem:[%s7167_s16 + $0xa00] ss:$8 sps:$4 sm:$0xff]  }
 0x15e   : > { %3995 = vmatpush1.bf16.msra.mxu0 %v5955_v24  ;;  %3709 = vmatprep.subr.bf16.mxu1 %v5960_v26  ;;  %v4987_v24 = vcombine.low %v7337_v20, %v7337_v20  ;;  %v7411_v26 = vld [vmem:[#allocation4 + $0x18] sm:$0xff] }
 0x15f   : > { %3996 = vmatprep.subr.bf16.mxu0 %v5963_v27  ;;  %v7413_v27 = vld [vmem:[#allocation4 + $0x50] sm:$0xff]  ;;  %v4990_v20 = vcombine.high %v7411_v26, %v7411_v26 }
 0x160   : > { %v5004_v22 = vcombine.high %v7413_v27, %v7413_v27 }
 0x161   : > { %3710 = vmatpush1.bf16.msra.mxu1 %v5958_v28  ;;  %v6054_v28 = vld [vmem:[%s7167_s16 + $0x314] ss:$8 sps:$4 sm:$0xff]  }
 0x162   : > { %3997 = vmatpush1.bf16.msra.mxu0 %v5961_v29  ;;  %3711 = vmatprep.subr.bf16.mxu1 %v5966_v30  ;;  %v6057_v29 = vld [vmem:[%s7167_s16 + $0xa14] ss:$8 sps:$4 sm:$0xff]   ;;  %v6052_v30 = vld [vmem:[%s7167_s16 + $0x310] ss:$8 sps:$4 sm:$0xff]  }
 0x163   : > { %3998 = vmatprep.subr.bf16.mxu0 %v5969_v31  ;;  %v6055_v31 = vld [vmem:[%s7167_s16 + $0xa10] ss:$8 sps:$4 sm:$0xff]  }
 0x165   : > { %3712 = vmatpush1.bf16.msra.mxu1 %v5964_v32  ;;  %v6060_v32 = vld [vmem:[%s7167_s16 + $0x324] ss:$8 sps:$4 sm:$0xff]  }
 0x166   : > { %3999 = vmatpush1.bf16.msra.mxu0 %v5967_v33  ;;  %3713 = vmatprep.subr.bf16.mxu1 %v5972_v34  ;;  %v6063_v33 = vld [vmem:[%s7167_s16 + $0xa24] ss:$8 sps:$4 sm:$0xff]   ;;  %v6058_v34 = vld [vmem:[%s7167_s16 + $0x320] ss:$8 sps:$4 sm:$0xff]  }
 0x167   : > { %4000 = vmatprep.subr.bf16.mxu0 %v5975_v35  ;;  %v6061_v35 = vld [vmem:[%s7167_s16 + $0xa20] ss:$8 sps:$4 sm:$0xff]  }
 0x169   : > { %3714 = vmatpush1.bf16.msra.mxu1 %v5970_v36  ;;  %v6066_v36 = vld [vmem:[%s7167_s16 + $0x334] ss:$8 sps:$4 sm:$0xff]  }
 0x16a   : > { %4001 = vmatpush1.bf16.msra.mxu0 %v5973_v37  ;;  %3715 = vmatprep.subr.bf16.mxu1 %v5978_v38  ;;  %v6069_v37 = vld [vmem:[%s7167_s16 + $0xa34] ss:$8 sps:$4 sm:$0xff]   ;;  %v6064_v38 = vld [vmem:[%s7167_s16 + $0x330] ss:$8 sps:$4 sm:$0xff]  }
 0x16b   : > { %4002 = vmatprep.subr.bf16.mxu0 %v5981_v39  ;;  %v6067_v39 = vld [vmem:[%s7167_s16 + $0xa30] ss:$8 sps:$4 sm:$0xff]  }
 0x16d   : > { %3716 = vmatpush1.bf16.msra.mxu1 %v5976_v40  ;;  %v6072_v40 = vld [vmem:[%s7167_s16 + $0x344] ss:$8 sps:$4 sm:$0xff]  }
 0x16e   : > { %4003 = vmatpush1.bf16.msra.mxu0 %v5979_v41  ;;  %3717 = vmatprep.subr.bf16.mxu1 %v5984_v42  ;;  %v6075_v41 = vld [vmem:[%s7167_s16 + $0xa44] ss:$8 sps:$4 sm:$0xff]   ;;  %v6070_v42 = vld [vmem:[%s7167_s16 + $0x340] ss:$8 sps:$4 sm:$0xff]  }
 0x16f   : > { %4004 = vmatprep.subr.bf16.mxu0 %v5987_v43  ;;  %v6073_v43 = vld [vmem:[%s7167_s16 + $0xa40] ss:$8 sps:$4 sm:$0xff]  }
 0x171   : > { %3718 = vmatpush1.bf16.msra.mxu1 %v5982_v44  ;;  %v6078_v44 = vld [vmem:[%s7167_s16 + $0x354] ss:$8 sps:$4 sm:$0xff]  }
 0x172   : > { %4005 = vmatpush1.bf16.msra.mxu0 %v5985_v45  ;;  %3719 = vmatprep.subr.bf16.mxu1 %v5990_v46  ;;  %v6081_v45 = vld [vmem:[%s7167_s16 + $0xa54] ss:$8 sps:$4 sm:$0xff]   ;;  %v6076_v46 = vld [vmem:[%s7167_s16 + $0x350] ss:$8 sps:$4 sm:$0xff]  }
 0x173   : > { %4006 = vmatprep.subr.bf16.mxu0 %v5993_v47  ;;  %v6079_v47 = vld [vmem:[%s7167_s16 + $0xa50] ss:$8 sps:$4 sm:$0xff]  }
 0x175   : > { %3720 = vmatpush1.bf16.msra.mxu1 %v5988_v48  ;;  %v6084_v48 = vld [vmem:[%s7167_s16 + $0x364] ss:$8 sps:$4 sm:$0xff]  }
 0x176   : > { %4007 = vmatpush1.bf16.msra.mxu0 %v5991_v49  ;;  %3721 = vmatprep.subr.bf16.mxu1 %v5996_v50  ;;  %v6087_v49 = vld [vmem:[%s7167_s16 + $0xa64] ss:$8 sps:$4 sm:$0xff]   ;;  %v6082_v50 = vld [vmem:[%s7167_s16 + $0x360] ss:$8 sps:$4 sm:$0xff]  }
 0x177   : > { %4008 = vmatprep.subr.bf16.mxu0 %v5999_v51  ;;  %v6085_v51 = vld [vmem:[%s7167_s16 + $0xa60] ss:$8 sps:$4 sm:$0xff]  }
 0x179   : > { %3722 = vmatpush1.bf16.msra.mxu1 %v5994_v52  ;;  %v6090_v52 = vld [vmem:[%s7167_s16 + $0x374] ss:$8 sps:$4 sm:$0xff]  }
 0x17a   : > { %4009 = vmatpush1.bf16.msra.mxu0 %v5997_v53  ;;  %3723 = vmatprep.subr.bf16.mxu1 %v6002_v54  ;;  %v6093_v53 = vld [vmem:[%s7167_s16 + $0xa74] ss:$8 sps:$4 sm:$0xff]   ;;  %v6088_v54 = vld [vmem:[%s7167_s16 + $0x370] ss:$8 sps:$4 sm:$0xff]  }
 0x17b   : > { %4010 = vmatprep.subr.bf16.mxu0 %v6005_v55  ;;  %v6091_v55 = vld [vmem:[%s7167_s16 + $0xa70] ss:$8 sps:$4 sm:$0xff]  }
 0x17d   : > { %3724 = vmatpush1.bf16.msra.mxu1 %v6000_v56  ;;  %v6096_v56 = vld [vmem:[%s7167_s16 + $0x384] ss:$8 sps:$4 sm:$0xff]  }
 0x17e   : > { %4011 = vmatpush1.bf16.msra.mxu0 %v6003_v57  ;;  %3725 = vmatprep.subr.bf16.mxu1 %v6008_v58  ;;  %v6099_v57 = vld [vmem:[%s7167_s16 + $0xa84] ss:$8 sps:$4 sm:$0xff]   ;;  %v6094_v58 = vld [vmem:[%s7167_s16 + $0x380] ss:$8 sps:$4 sm:$0xff]  }
 0x17f   : > { %4012 = vmatprep.subr.bf16.mxu0 %v6011_v59  ;;  %v6097_v59 = vld [vmem:[%s7167_s16 + $0xa80] ss:$8 sps:$4 sm:$0xff]  }
 0x181   : > { %3726 = vmatpush1.bf16.msra.mxu1 %v6006_v60  ;;  %v6102_v60 = vld [vmem:[%s7167_s16 + $0x394] ss:$8 sps:$4 sm:$0xff]  }
 0x182   : > { %4013 = vmatpush1.bf16.msra.mxu0 %v6009_v61  ;;  %3727 = vmatprep.subr.bf16.mxu1 %v6014_v62  ;;  %v6105_v61 = vld [vmem:[%s7167_s16 + $0xa94] ss:$8 sps:$4 sm:$0xff]   ;;  %v6100_v62 = vld [vmem:[%s7167_s16 + $0x390] ss:$8 sps:$4 sm:$0xff]  }
 0x183   : > { %4014 = vmatprep.subr.bf16.mxu0 %v6017_v63  ;;  %v6103_v63 = vld [vmem:[%s7167_s16 + $0xa90] ss:$8 sps:$4 sm:$0xff]  }
 0x185   : > { %3728 = vmatpush1.bf16.msra.mxu1 %v6012_v0  ;;  %v6108_v0 = vld [vmem:[%s7167_s16 + $0x3a4] ss:$8 sps:$4 sm:$0xff]  }
 0x186   : > { %4015 = vmatpush1.bf16.msra.mxu0 %v6015_v1  ;;  %3729 = vmatprep.subr.bf16.mxu1 %v6020_v2  ;;  %v6111_v1 = vld [vmem:[%s7167_s16 + $0xaa4] ss:$8 sps:$4 sm:$0xff]   ;;  %v6106_v2 = vld [vmem:[%s7167_s16 + $0x3a0] ss:$8 sps:$4 sm:$0xff]  }
 0x187   : > { %4016 = vmatprep.subr.bf16.mxu0 %v6023_v3  ;;  %v6109_v3 = vld [vmem:[%s7167_s16 + $0xaa0] ss:$8 sps:$4 sm:$0xff]  }
 0x189   : > { %3730 = vmatpush1.bf16.msra.mxu1 %v6018_v4  ;;  %v6114_v4 = vld [vmem:[%s7167_s16 + $0x3b4] ss:$8 sps:$4 sm:$0xff]  }
 0x18a   : > { %4017 = vmatpush1.bf16.msra.mxu0 %v6021_v5  ;;  %3731 = vmatprep.subr.bf16.mxu1 %v6026_v6  ;;  %v6117_v5 = vld [vmem:[%s7167_s16 + $0xab4] ss:$8 sps:$4 sm:$0xff]   ;;  %v6112_v6 = vld [vmem:[%s7167_s16 + $0x3b0] ss:$8 sps:$4 sm:$0xff]  }
 0x18b   : > { %4018 = vmatprep.subr.bf16.mxu0 %v6029_v7  ;;  %v6115_v7 = vld [vmem:[%s7167_s16 + $0xab0] ss:$8 sps:$4 sm:$0xff]  }
 0x18d   : > { %3732 = vmatpush1.bf16.msra.mxu1 %v6024_v8  ;;  %v6120_v8 = vld [vmem:[%s7167_s16 + $0x3c4] ss:$8 sps:$4 sm:$0xff]  }
 0x18e   : > { %4019 = vmatpush1.bf16.msra.mxu0 %v6027_v9  ;;  %3733 = vmatprep.subr.bf16.mxu1 %v6032_v10  ;;  %v6123_v9 = vld [vmem:[%s7167_s16 + $0xac4] ss:$8 sps:$4 sm:$0xff]   ;;  %v6118_v10 = vld [vmem:[%s7167_s16 + $0x3c0] ss:$8 sps:$4 sm:$0xff]  }
 0x18f   : > { %4020 = vmatprep.subr.bf16.mxu0 %v6035_v11  ;;  %v6121_v11 = vld [vmem:[%s7167_s16 + $0xac0] ss:$8 sps:$4 sm:$0xff]  }
 0x191   : > { %3734 = vmatpush1.bf16.msra.mxu1 %v6030_v12  ;;  %v6126_v12 = vld [vmem:[%s7167_s16 + $0x3d4] ss:$8 sps:$4 sm:$0xff]  }
 0x192   : > { %4021 = vmatpush1.bf16.msra.mxu0 %v6033_v13  ;;  %3735 = vmatprep.subr.bf16.mxu1 %v6038_v14  ;;  %v6129_v13 = vld [vmem:[%s7167_s16 + $0xad4] ss:$8 sps:$4 sm:$0xff]   ;;  %v6124_v14 = vld [vmem:[%s7167_s16 + $0x3d0] ss:$8 sps:$4 sm:$0xff]  }
 0x193   : > { %4022 = vmatprep.subr.bf16.mxu0 %v6041_v15  ;;  %v6127_v15 = vld [vmem:[%s7167_s16 + $0xad0] ss:$8 sps:$4 sm:$0xff]  }
 0x195   : > { %3736 = vmatpush1.bf16.msra.mxu1 %v6036_v16  ;;  %v6132_v16 = vld [vmem:[%s7167_s16 + $0x3e4] ss:$8 sps:$4 sm:$0xff]  }
 0x196   : > { %4023 = vmatpush1.bf16.msra.mxu0 %v6039_v17  ;;  %3746 = vmatprep.subr.bf16.mxu1 %v6046_v18  ;;  %v6135_v17 = vld [vmem:[%s7167_s16 + $0xae4] ss:$8 sps:$4 sm:$0xff]   ;;  %v6130_v18 = vld [vmem:[%s7167_s16 + $0x3e0] ss:$8 sps:$4 sm:$0xff]  }
 0x197   : > { %4033 = vmatprep.subr.bf16.mxu0 %v6051_v19  ;;  %v6133_v19 = vld [vmem:[%s7167_s16 + $0xae0] ss:$8 sps:$4 sm:$0xff]  }
 0x198   : > { %3738 = vmatmul.mubr.bf16.vlgmr.msra.gmra.mrb[0].mxu1 %v4987_v24  ;;  %v6136_v24 = vld [vmem:[%s7167_s16 + $0x3f0] ss:$8 sps:$4 sm:$0xff]  }
 0x199   : > { %4025 = vmatmul.mubr.bf16.vlgmr.msra.gmra.mrb[0].mxu0 %v5001_v25  ;;  %3747 = vmatpush1.bf16.msra.mxu1 %v6044_v21  ;;  %v6138_v21 = vld [vmem:[%s7167_s16 + $0x3f4] ss:$8 sps:$4 sm:$0xff]   ;;  %v6139_v25 = vld [vmem:[%s7167_s16 + $0xaf0] ss:$8 sps:$4 sm:$0xff]  }
 0x19a   : > { %4034 = vmatpush1.bf16.msra.mxu0 %v6049_v23  ;;  %3748 = vmatprep.subr.bf16.mxu1 %v6054_v28  ;;  %v6141_v23 = vld [vmem:[%s7167_s16 + $0xaf4] ss:$8 sps:$4 sm:$0xff]   ;;  %v6146_v28 = vld [vmem:[%s7167_s16 + $0x404] ss:$8 sps:$4 sm:$0xff]  }
 0x19b   : > { %4035 = vmatprep.subr.bf16.mxu0 %v6057_v29  ;;  %3778 = vmatprep.mubr.bf16.mxu1 %v4990_v20  ;;  %v6151_v29 = vld [vmem:[%s7167_s16 + $0xb04] ss:$8 sps:$4 sm:$0xff]  }
 0x19c   : > { %4065 = vmatprep.mubr.bf16.mxu0 %v5004_v22  ;;  %v7481_v20 = vld [vmem:[#allocation4 + $0x20] sm:$0xff]  ;;  %v4989_v22 = vcombine.low %v7411_v26, %v7411_v26 }
 0x19d   : > { %3749 = vmatpush1.bf16.msra.mxu1 %v6052_v30  ;;  %v5003_v30 = vcombine.low %v7413_v27, %v7413_v27  ;;  %v4992_v26 = vcombine.high %v7481_v20, %v7481_v20 }
 0x19e   : > { %4036 = vmatpush1.bf16.msra.mxu0 %v6055_v31  ;;  %3750 = vmatprep.subr.bf16.mxu1 %v6060_v32  ;;  %v7487_v31 = vld [vmem:[#allocation4 + $0x58] sm:$0xff]  ;;  %v6144_v32 = vld [vmem:[%s7167_s16 + $0x400] ss:$8 sps:$4 sm:$0xff]  }
 0x19f   : > { %4037 = vmatprep.subr.bf16.mxu0 %v6063_v33  ;;  %v6149_v33 = vld [vmem:[%s7167_s16 + $0xb00] ss:$8 sps:$4 sm:$0xff]   ;;  %v5006_v27 = vcombine.high %v7487_v31, %v7487_v31 }
 0x1a1   : > { %3751 = vmatpush1.bf16.msra.mxu1 %v6058_v34  ;;  %v6154_v34 = vld [vmem:[%s7167_s16 + $0x414] ss:$8 sps:$4 sm:$0xff]  }
 0x1a2   : > { %4038 = vmatpush1.bf16.msra.mxu0 %v6061_v35  ;;  %3752 = vmatprep.subr.bf16.mxu1 %v6066_v36  ;;  %v6157_v35 = vld [vmem:[%s7167_s16 + $0xb14] ss:$8 sps:$4 sm:$0xff]   ;;  %v6152_v36 = vld [vmem:[%s7167_s16 + $0x410] ss:$8 sps:$4 sm:$0xff]  }
 0x1a3   : > { %4039 = vmatprep.subr.bf16.mxu0 %v6069_v37  ;;  %v6155_v37 = vld [vmem:[%s7167_s16 + $0xb10] ss:$8 sps:$4 sm:$0xff]  }
 0x1a5   : > { %3753 = vmatpush1.bf16.msra.mxu1 %v6064_v38  ;;  %v6160_v38 = vld [vmem:[%s7167_s16 + $0x424] ss:$8 sps:$4 sm:$0xff]  }
 0x1a6   : > { %4040 = vmatpush1.bf16.msra.mxu0 %v6067_v39  ;;  %3754 = vmatprep.subr.bf16.mxu1 %v6072_v40  ;;  %v6163_v39 = vld [vmem:[%s7167_s16 + $0xb24] ss:$8 sps:$4 sm:$0xff]   ;;  %v6158_v40 = vld [vmem:[%s7167_s16 + $0x420] ss:$8 sps:$4 sm:$0xff]  }
 0x1a7   : > { %4041 = vmatprep.subr.bf16.mxu0 %v6075_v41  ;;  %v6161_v41 = vld [vmem:[%s7167_s16 + $0xb20] ss:$8 sps:$4 sm:$0xff]  }
 0x1a9   : > { %3755 = vmatpush1.bf16.msra.mxu1 %v6070_v42  ;;  %v6166_v42 = vld [vmem:[%s7167_s16 + $0x434] ss:$8 sps:$4 sm:$0xff]  }
 0x1aa   : > { %4042 = vmatpush1.bf16.msra.mxu0 %v6073_v43  ;;  %3756 = vmatprep.subr.bf16.mxu1 %v6078_v44  ;;  %v6169_v43 = vld [vmem:[%s7167_s16 + $0xb34] ss:$8 sps:$4 sm:$0xff]   ;;  %v6164_v44 = vld [vmem:[%s7167_s16 + $0x430] ss:$8 sps:$4 sm:$0xff]  }
 0x1ab   : > { %4043 = vmatprep.subr.bf16.mxu0 %v6081_v45  ;;  %v6167_v45 = vld [vmem:[%s7167_s16 + $0xb30] ss:$8 sps:$4 sm:$0xff]  }
 0x1ad   : > { %3757 = vmatpush1.bf16.msra.mxu1 %v6076_v46  ;;  %v6172_v46 = vld [vmem:[%s7167_s16 + $0x444] ss:$8 sps:$4 sm:$0xff]  }
 0x1ae   : > { %4044 = vmatpush1.bf16.msra.mxu0 %v6079_v47  ;;  %3758 = vmatprep.subr.bf16.mxu1 %v6084_v48  ;;  %v6175_v47 = vld [vmem:[%s7167_s16 + $0xb44] ss:$8 sps:$4 sm:$0xff]   ;;  %v6170_v48 = vld [vmem:[%s7167_s16 + $0x440] ss:$8 sps:$4 sm:$0xff]  }
 0x1af   : > { %4045 = vmatprep.subr.bf16.mxu0 %v6087_v49  ;;  %v6173_v49 = vld [vmem:[%s7167_s16 + $0xb40] ss:$8 sps:$4 sm:$0xff]  }
 0x1b1   : > { %3759 = vmatpush1.bf16.msra.mxu1 %v6082_v50  ;;  %v6178_v50 = vld [vmem:[%s7167_s16 + $0x454] ss:$8 sps:$4 sm:$0xff]  }
 0x1b2   : > { %4046 = vmatpush1.bf16.msra.mxu0 %v6085_v51  ;;  %3760 = vmatprep.subr.bf16.mxu1 %v6090_v52  ;;  %v6181_v51 = vld [vmem:[%s7167_s16 + $0xb54] ss:$8 sps:$4 sm:$0xff]   ;;  %v6176_v52 = vld [vmem:[%s7167_s16 + $0x450] ss:$8 sps:$4 sm:$0xff]  }
 0x1b3   : > { %4047 = vmatprep.subr.bf16.mxu0 %v6093_v53  ;;  %v6179_v53 = vld [vmem:[%s7167_s16 + $0xb50] ss:$8 sps:$4 sm:$0xff]  }
 0x1b5   : > { %3761 = vmatpush1.bf16.msra.mxu1 %v6088_v54  ;;  %v6184_v54 = vld [vmem:[%s7167_s16 + $0x464] ss:$8 sps:$4 sm:$0xff]  }
 0x1b6   : > { %4048 = vmatpush1.bf16.msra.mxu0 %v6091_v55  ;;  %3762 = vmatprep.subr.bf16.mxu1 %v6096_v56  ;;  %v6187_v55 = vld [vmem:[%s7167_s16 + $0xb64] ss:$8 sps:$4 sm:$0xff]   ;;  %v6182_v56 = vld [vmem:[%s7167_s16 + $0x460] ss:$8 sps:$4 sm:$0xff]  }
 0x1b7   : > { %4049 = vmatprep.subr.bf16.mxu0 %v6099_v57  ;;  %v6185_v57 = vld [vmem:[%s7167_s16 + $0xb60] ss:$8 sps:$4 sm:$0xff]  }
 0x1b9   : > { %3763 = vmatpush1.bf16.msra.mxu1 %v6094_v58  ;;  %v6190_v58 = vld [vmem:[%s7167_s16 + $0x474] ss:$8 sps:$4 sm:$0xff]  }
 0x1ba   : > { %4050 = vmatpush1.bf16.msra.mxu0 %v6097_v59  ;;  %3764 = vmatprep.subr.bf16.mxu1 %v6102_v60  ;;  %v6193_v59 = vld [vmem:[%s7167_s16 + $0xb74] ss:$8 sps:$4 sm:$0xff]   ;;  %v6188_v60 = vld [vmem:[%s7167_s16 + $0x470] ss:$8 sps:$4 sm:$0xff]  }
 0x1bb   : > { %4051 = vmatprep.subr.bf16.mxu0 %v6105_v61  ;;  %v6191_v61 = vld [vmem:[%s7167_s16 + $0xb70] ss:$8 sps:$4 sm:$0xff]  }
 0x1bd   : > { %3765 = vmatpush1.bf16.msra.mxu1 %v6100_v62  ;;  %v6196_v62 = vld [vmem:[%s7167_s16 + $0x484] ss:$8 sps:$4 sm:$0xff]  }
 0x1be   : > { %4052 = vmatpush1.bf16.msra.mxu0 %v6103_v63  ;;  %3766 = vmatprep.subr.bf16.mxu1 %v6108_v0  ;;  %v6199_v63 = vld [vmem:[%s7167_s16 + $0xb84] ss:$8 sps:$4 sm:$0xff]   ;;  %v6194_v0 = vld [vmem:[%s7167_s16 + $0x480] ss:$8 sps:$4 sm:$0xff]  }
 0x1bf   : > { %4053 = vmatprep.subr.bf16.mxu0 %v6111_v1  ;;  %v6197_v1 = vld [vmem:[%s7167_s16 + $0xb80] ss:$8 sps:$4 sm:$0xff]  }
 0x1c1   : > { %3767 = vmatpush1.bf16.msra.mxu1 %v6106_v2  ;;  %v6202_v2 = vld [vmem:[%s7167_s16 + $0x494] ss:$8 sps:$4 sm:$0xff]  }
 0x1c2   : > { %4054 = vmatpush1.bf16.msra.mxu0 %v6109_v3  ;;  %3768 = vmatprep.subr.bf16.mxu1 %v6114_v4  ;;  %v6205_v3 = vld [vmem:[%s7167_s16 + $0xb94] ss:$8 sps:$4 sm:$0xff]   ;;  %v6200_v4 = vld [vmem:[%s7167_s16 + $0x490] ss:$8 sps:$4 sm:$0xff]  }
 0x1c3   : > { %4055 = vmatprep.subr.bf16.mxu0 %v6117_v5  ;;  %v6203_v5 = vld [vmem:[%s7167_s16 + $0xb90] ss:$8 sps:$4 sm:$0xff]  }
 0x1c5   : > { %3769 = vmatpush1.bf16.msra.mxu1 %v6112_v6  ;;  %v6208_v6 = vld [vmem:[%s7167_s16 + $0x4a4] ss:$8 sps:$4 sm:$0xff]  }
 0x1c6   : > { %4056 = vmatpush1.bf16.msra.mxu0 %v6115_v7  ;;  %3770 = vmatprep.subr.bf16.mxu1 %v6120_v8  ;;  %v6211_v7 = vld [vmem:[%s7167_s16 + $0xba4] ss:$8 sps:$4 sm:$0xff]   ;;  %v6206_v8 = vld [vmem:[%s7167_s16 + $0x4a0] ss:$8 sps:$4 sm:$0xff]  }
 0x1c7   : > { %4057 = vmatprep.subr.bf16.mxu0 %v6123_v9  ;;  %v6209_v9 = vld [vmem:[%s7167_s16 + $0xba0] ss:$8 sps:$4 sm:$0xff]  }
 0x1c9   : > { %3771 = vmatpush1.bf16.msra.mxu1 %v6118_v10  ;;  %v6214_v10 = vld [vmem:[%s7167_s16 + $0x4b4] ss:$8 sps:$4 sm:$0xff]  }
 0x1ca   : > { %4058 = vmatpush1.bf16.msra.mxu0 %v6121_v11  ;;  %3772 = vmatprep.subr.bf16.mxu1 %v6126_v12  ;;  %v6217_v11 = vld [vmem:[%s7167_s16 + $0xbb4] ss:$8 sps:$4 sm:$0xff]   ;;  %v6212_v12 = vld [vmem:[%s7167_s16 + $0x4b0] ss:$8 sps:$4 sm:$0xff]  }
 0x1cb   : > { %4059 = vmatprep.subr.bf16.mxu0 %v6129_v13  ;;  %v6215_v13 = vld [vmem:[%s7167_s16 + $0xbb0] ss:$8 sps:$4 sm:$0xff]  }
 0x1cd   : > { %3773 = vmatpush1.bf16.msra.mxu1 %v6124_v14  ;;  %v6220_v14 = vld [vmem:[%s7167_s16 + $0x4c4] ss:$8 sps:$4 sm:$0xff]  }
 0x1ce   : > { %4060 = vmatpush1.bf16.msra.mxu0 %v6127_v15  ;;  %3774 = vmatprep.subr.bf16.mxu1 %v6132_v16  ;;  %v6223_v15 = vld [vmem:[%s7167_s16 + $0xbc4] ss:$8 sps:$4 sm:$0xff]   ;;  %v6218_v16 = vld [vmem:[%s7167_s16 + $0x4c0] ss:$8 sps:$4 sm:$0xff]  }
 0x1cf   : > { %4061 = vmatprep.subr.bf16.mxu0 %v6135_v17  ;;  %v6221_v17 = vld [vmem:[%s7167_s16 + $0xbc0] ss:$8 sps:$4 sm:$0xff]  }
 0x1d1   : > { %3775 = vmatpush1.bf16.msra.mxu1 %v6130_v18  ;;  %v6226_v18 = vld [vmem:[%s7167_s16 + $0x4d4] ss:$8 sps:$4 sm:$0xff]  }
 0x1d2   : > { %4062 = vmatpush1.bf16.msra.mxu0 %v6133_v19  ;;  %3776 = vmatprep.subr.bf16.mxu1 %v6138_v21  ;;  %v6229_v19 = vld [vmem:[%s7167_s16 + $0xbd4] ss:$8 sps:$4 sm:$0xff]   ;;  %v6224_v21 = vld [vmem:[%s7167_s16 + $0x4d0] ss:$8 sps:$4 sm:$0xff]  }
 0x1d3   : > { %4063 = vmatprep.subr.bf16.mxu0 %v6141_v23  ;;  %v6227_v23 = vld [vmem:[%s7167_s16 + $0xbd0] ss:$8 sps:$4 sm:$0xff]  }
 0x1d5   : > { %3777 = vmatpush1.bf16.msra.mxu1 %v6136_v24  ;;  %v6232_v24 = vld [vmem:[%s7167_s16 + $0x4e4] ss:$8 sps:$4 sm:$0xff]  }
 0x1d6   : > { %4064 = vmatpush1.bf16.msra.mxu0 %v6139_v25  ;;  %3787 = vmatprep.subr.bf16.mxu1 %v6146_v28  ;;  %v6235_v25 = vld [vmem:[%s7167_s16 + $0xbe4] ss:$8 sps:$4 sm:$0xff]   ;;  %v6230_v28 = vld [vmem:[%s7167_s16 + $0x4e0] ss:$8 sps:$4 sm:$0xff]  }
 0x1d7   : > { %4074 = vmatprep.subr.bf16.mxu0 %v6151_v29  ;;  %v6233_v29 = vld [vmem:[%s7167_s16 + $0xbe0] ss:$8 sps:$4 sm:$0xff]  }
 0x1d8   : > { %3779 = vmatmul.mubr.bf16.vlgmr.msra.gmra.mrb[0].mxu1 %v4989_v22  ;;  %v6238_v22 = vld [vmem:[%s7167_s16 + $0x4f4] ss:$8 sps:$4 sm:$0xff]  }
 0x1d9   : > { %4066 = vmatmul.mubr.bf16.vlgmr.msra.gmra.mrb[0].mxu0 %v5003_v30  ;;  %3788 = vmatpush1.bf16.msra.mxu1 %v6144_v32  ;;  %v6241_v30 = vld [vmem:[%s7167_s16 + $0xbf4] ss:$8 sps:$4 sm:$0xff]   ;;  %v6236_v32 = vld [vmem:[%s7167_s16 + $0x4f0] ss:$8 sps:$4 sm:$0xff]  }
 0x1da   : > { %4075 = vmatpush1.bf16.msra.mxu0 %v6149_v33  ;;  %3789 = vmatprep.subr.bf16.mxu1 %v6154_v34  ;;  %v6239_v33 = vld [vmem:[%s7167_s16 + $0xbf0] ss:$8 sps:$4 sm:$0xff]   ;;  %v6246_v34 = vld [vmem:[%s7167_s16 + $0x504] ss:$8 sps:$4 sm:$0xff]  }
 0x1db   : > { %4076 = vmatprep.subr.bf16.mxu0 %v6157_v35  ;;  %3819 = vmatprep.mubr.bf16.mxu1 %v4992_v26  ;;  %v6251_v35 = vld [vmem:[%s7167_s16 + $0xc04] ss:$8 sps:$4 sm:$0xff]  }
 0x1dc   : > { %4106 = vmatprep.mubr.bf16.mxu0 %v5006_v27  ;;  %v7557_v26 = vld [vmem:[#allocation4 + $0x28] sm:$0xff] }
 0x1dd   : > { %3790 = vmatpush1.bf16.msra.mxu1 %v6152_v36  ;;  %v6244_v27 = vld [vmem:[%s7167_s16 + $0x500] ss:$8 sps:$4 sm:$0xff]  }
 0x1de   : > { %4077 = vmatpush1.bf16.msra.mxu0 %v6155_v37  ;;  %3791 = vmatprep.subr.bf16.mxu1 %v6160_v38  ;;  %v6249_v36 = vld [vmem:[%s7167_s16 + $0xc00] ss:$8 sps:$4 sm:$0xff]   ;;  %v4991_v37 = vcombine.low %v7481_v20, %v7481_v20  ;;  %v5005_v38 = vcombine.low %v7487_v31, %v7487_v31  ;;  %v4994_v20 = vcombine.high %v7557_v26, %v7557_v26 }
 0x1df   : > { %4078 = vmatprep.subr.bf16.mxu0 %v6163_v39  ;;  %v7565_v39 = vld [vmem:[#allocation4 + $0x60] sm:$0xff] }
 0x1e0   : > { %v5008_v31 = vcombine.high %v7565_v39, %v7565_v39 }
 0x1e1   : > { %3792 = vmatpush1.bf16.msra.mxu1 %v6158_v40  ;;  %v6254_v40 = vld [vmem:[%s7167_s16 + $0x514] ss:$8 sps:$4 sm:$0xff]  }
 0x1e2   : > { %4079 = vmatpush1.bf16.msra.mxu0 %v6161_v41  ;;  %3793 = vmatprep.subr.bf16.mxu1 %v6166_v42  ;;  %v6257_v41 = vld [vmem:[%s7167_s16 + $0xc14] ss:$8 sps:$4 sm:$0xff]   ;;  %v6252_v42 = vld [vmem:[%s7167_s16 + $0x510] ss:$8 sps:$4 sm:$0xff]  }
 0x1e3   : > { %4080 = vmatprep.subr.bf16.mxu0 %v6169_v43  ;;  %v6255_v43 = vld [vmem:[%s7167_s16 + $0xc10] ss:$8 sps:$4 sm:$0xff]  }
 0x1e5   : > { %3794 = vmatpush1.bf16.msra.mxu1 %v6164_v44  ;;  %v6260_v44 = vld [vmem:[%s7167_s16 + $0x524] ss:$8 sps:$4 sm:$0xff]  }
 0x1e6   : > { %4081 = vmatpush1.bf16.msra.mxu0 %v6167_v45  ;;  %3795 = vmatprep.subr.bf16.mxu1 %v6172_v46  ;;  %v6263_v45 = vld [vmem:[%s7167_s16 + $0xc24] ss:$8 sps:$4 sm:$0xff]   ;;  %v6258_v46 = vld [vmem:[%s7167_s16 + $0x520] ss:$8 sps:$4 sm:$0xff]  }
 0x1e7   : > { %4082 = vmatprep.subr.bf16.mxu0 %v6175_v47  ;;  %v6261_v47 = vld [vmem:[%s7167_s16 + $0xc20] ss:$8 sps:$4 sm:$0xff]  }
 0x1e9   : > { %3796 = vmatpush1.bf16.msra.mxu1 %v6170_v48  ;;  %v6266_v48 = vld [vmem:[%s7167_s16 + $0x534] ss:$8 sps:$4 sm:$0xff]  }
 0x1ea   : > { %4083 = vmatpush1.bf16.msra.mxu0 %v6173_v49  ;;  %3797 = vmatprep.subr.bf16.mxu1 %v6178_v50  ;;  %v6269_v49 = vld [vmem:[%s7167_s16 + $0xc34] ss:$8 sps:$4 sm:$0xff]   ;;  %v6264_v50 = vld [vmem:[%s7167_s16 + $0x530] ss:$8 sps:$4 sm:$0xff]  }
 0x1eb   : > { %4084 = vmatprep.subr.bf16.mxu0 %v6181_v51  ;;  %v6267_v51 = vld [vmem:[%s7167_s16 + $0xc30] ss:$8 sps:$4 sm:$0xff]  }
 0x1ed   : > { %3798 = vmatpush1.bf16.msra.mxu1 %v6176_v52  ;;  %v6272_v52 = vld [vmem:[%s7167_s16 + $0x544] ss:$8 sps:$4 sm:$0xff]  }
 0x1ee   : > { %4085 = vmatpush1.bf16.msra.mxu0 %v6179_v53  ;;  %3799 = vmatprep.subr.bf16.mxu1 %v6184_v54  ;;  %v6275_v53 = vld [vmem:[%s7167_s16 + $0xc44] ss:$8 sps:$4 sm:$0xff]   ;;  %v6270_v54 = vld [vmem:[%s7167_s16 + $0x540] ss:$8 sps:$4 sm:$0xff]  }
 0x1ef   : > { %4086 = vmatprep.subr.bf16.mxu0 %v6187_v55  ;;  %v6273_v55 = vld [vmem:[%s7167_s16 + $0xc40] ss:$8 sps:$4 sm:$0xff]  }
 0x1f1   : > { %3800 = vmatpush1.bf16.msra.mxu1 %v6182_v56  ;;  %v6278_v56 = vld [vmem:[%s7167_s16 + $0x554] ss:$8 sps:$4 sm:$0xff]  }
 0x1f2   : > { %4087 = vmatpush1.bf16.msra.mxu0 %v6185_v57  ;;  %3801 = vmatprep.subr.bf16.mxu1 %v6190_v58  ;;  %v6281_v57 = vld [vmem:[%s7167_s16 + $0xc54] ss:$8 sps:$4 sm:$0xff]   ;;  %v6276_v58 = vld [vmem:[%s7167_s16 + $0x550] ss:$8 sps:$4 sm:$0xff]  }
 0x1f3   : > { %4088 = vmatprep.subr.bf16.mxu0 %v6193_v59  ;;  %v6279_v59 = vld [vmem:[%s7167_s16 + $0xc50] ss:$8 sps:$4 sm:$0xff]  }
 0x1f5   : > { %3802 = vmatpush1.bf16.msra.mxu1 %v6188_v60  ;;  %v6284_v60 = vld [vmem:[%s7167_s16 + $0x564] ss:$8 sps:$4 sm:$0xff]  }
 0x1f6   : > { %4089 = vmatpush1.bf16.msra.mxu0 %v6191_v61  ;;  %3803 = vmatprep.subr.bf16.mxu1 %v6196_v62  ;;  %v6287_v61 = vld [vmem:[%s7167_s16 + $0xc64] ss:$8 sps:$4 sm:$0xff]   ;;  %v6282_v62 = vld [vmem:[%s7167_s16 + $0x560] ss:$8 sps:$4 sm:$0xff]  }
 0x1f7   : > { %4090 = vmatprep.subr.bf16.mxu0 %v6199_v63  ;;  %v6285_v63 = vld [vmem:[%s7167_s16 + $0xc60] ss:$8 sps:$4 sm:$0xff]  }
 0x1f9   : > { %3804 = vmatpush1.bf16.msra.mxu1 %v6194_v0  ;;  %v6290_v0 = vld [vmem:[%s7167_s16 + $0x574] ss:$8 sps:$4 sm:$0xff]  }
 0x1fa   : > { %4091 = vmatpush1.bf16.msra.mxu0 %v6197_v1  ;;  %3805 = vmatprep.subr.bf16.mxu1 %v6202_v2  ;;  %v6293_v1 = vld [vmem:[%s7167_s16 + $0xc74] ss:$8 sps:$4 sm:$0xff]   ;;  %v6288_v2 = vld [vmem:[%s7167_s16 + $0x570] ss:$8 sps:$4 sm:$0xff]  }
 0x1fb   : > { %4092 = vmatprep.subr.bf16.mxu0 %v6205_v3  ;;  %v6291_v3 = vld [vmem:[%s7167_s16 + $0xc70] ss:$8 sps:$4 sm:$0xff]  }
 0x1fd   : > { %3806 = vmatpush1.bf16.msra.mxu1 %v6200_v4  ;;  %v6296_v4 = vld [vmem:[%s7167_s16 + $0x584] ss:$8 sps:$4 sm:$0xff]  }
 0x1fe   : > { %4093 = vmatpush1.bf16.msra.mxu0 %v6203_v5  ;;  %3807 = vmatprep.subr.bf16.mxu1 %v6208_v6  ;;  %v6299_v5 = vld [vmem:[%s7167_s16 + $0xc84] ss:$8 sps:$4 sm:$0xff]   ;;  %v6294_v6 = vld [vmem:[%s7167_s16 + $0x580] ss:$8 sps:$4 sm:$0xff]  }
 0x1ff   : > { %4094 = vmatprep.subr.bf16.mxu0 %v6211_v7  ;;  %v6297_v7 = vld [vmem:[%s7167_s16 + $0xc80] ss:$8 sps:$4 sm:$0xff]  }
 0x201   : > { %3808 = vmatpush1.bf16.msra.mxu1 %v6206_v8  ;;  %v6302_v8 = vld [vmem:[%s7167_s16 + $0x594] ss:$8 sps:$4 sm:$0xff]  }
 0x202   : > { %4095 = vmatpush1.bf16.msra.mxu0 %v6209_v9  ;;  %3809 = vmatprep.subr.bf16.mxu1 %v6214_v10  ;;  %v6305_v9 = vld [vmem:[%s7167_s16 + $0xc94] ss:$8 sps:$4 sm:$0xff]   ;;  %v6300_v10 = vld [vmem:[%s7167_s16 + $0x590] ss:$8 sps:$4 sm:$0xff]  }
 0x203   : > { %4096 = vmatprep.subr.bf16.mxu0 %v6217_v11  ;;  %v6303_v11 = vld [vmem:[%s7167_s16 + $0xc90] ss:$8 sps:$4 sm:$0xff]  }
 0x205   : > { %3810 = vmatpush1.bf16.msra.mxu1 %v6212_v12  ;;  %v6308_v12 = vld [vmem:[%s7167_s16 + $0x5a4] ss:$8 sps:$4 sm:$0xff]  }
 0x206   : > { %4097 = vmatpush1.bf16.msra.mxu0 %v6215_v13  ;;  %3811 = vmatprep.subr.bf16.mxu1 %v6220_v14  ;;  %v6311_v13 = vld [vmem:[%s7167_s16 + $0xca4] ss:$8 sps:$4 sm:$0xff]   ;;  %v6306_v14 = vld [vmem:[%s7167_s16 + $0x5a0] ss:$8 sps:$4 sm:$0xff]  }
 0x207   : > { %4098 = vmatprep.subr.bf16.mxu0 %v6223_v15  ;;  %v6309_v15 = vld [vmem:[%s7167_s16 + $0xca0] ss:$8 sps:$4 sm:$0xff]  }
 0x209   : > { %3812 = vmatpush1.bf16.msra.mxu1 %v6218_v16  ;;  %v6314_v16 = vld [vmem:[%s7167_s16 + $0x5b4] ss:$8 sps:$4 sm:$0xff]  }
 0x20a   : > { %4099 = vmatpush1.bf16.msra.mxu0 %v6221_v17  ;;  %3813 = vmatprep.subr.bf16.mxu1 %v6226_v18  ;;  %v6317_v17 = vld [vmem:[%s7167_s16 + $0xcb4] ss:$8 sps:$4 sm:$0xff]   ;;  %v6312_v18 = vld [vmem:[%s7167_s16 + $0x5b0] ss:$8 sps:$4 sm:$0xff]  }
 0x20b   : > { %4100 = vmatprep.subr.bf16.mxu0 %v6229_v19  ;;  %v6315_v19 = vld [vmem:[%s7167_s16 + $0xcb0] ss:$8 sps:$4 sm:$0xff]  }
 0x20d   : > { %3814 = vmatpush1.bf16.msra.mxu1 %v6224_v21  ;;  %v6320_v21 = vld [vmem:[%s7167_s16 + $0x5c4] ss:$8 sps:$4 sm:$0xff]  }
 0x20e   : > { %4101 = vmatpush1.bf16.msra.mxu0 %v6227_v23  ;;  %3815 = vmatprep.subr.bf16.mxu1 %v6232_v24  ;;  %v6323_v23 = vld [vmem:[%s7167_s16 + $0xcc4] ss:$8 sps:$4 sm:$0xff]   ;;  %v6318_v24 = vld [vmem:[%s7167_s16 + $0x5c0] ss:$8 sps:$4 sm:$0xff]  }
 0x20f   : > { %4102 = vmatprep.subr.bf16.mxu0 %v6235_v25  ;;  %v6321_v25 = vld [vmem:[%s7167_s16 + $0xcc0] ss:$8 sps:$4 sm:$0xff]  }
 0x211   : > { %3816 = vmatpush1.bf16.msra.mxu1 %v6230_v28  ;;  %v6326_v28 = vld [vmem:[%s7167_s16 + $0x5d4] ss:$8 sps:$4 sm:$0xff]  }
 0x212   : > { %4103 = vmatpush1.bf16.msra.mxu0 %v6233_v29  ;;  %3817 = vmatprep.subr.bf16.mxu1 %v6238_v22  ;;  %v6329_v29 = vld [vmem:[%s7167_s16 + $0xcd4] ss:$8 sps:$4 sm:$0xff]   ;;  %v6324_v22 = vld [vmem:[%s7167_s16 + $0x5d0] ss:$8 sps:$4 sm:$0xff]  }
 0x213   : > { %4104 = vmatprep.subr.bf16.mxu0 %v6241_v30  ;;  %v6327_v30 = vld [vmem:[%s7167_s16 + $0xcd0] ss:$8 sps:$4 sm:$0xff]  }
 0x215   : > { %3818 = vmatpush1.bf16.msra.mxu1 %v6236_v32  ;;  %v6332_v32 = vld [vmem:[%s7167_s16 + $0x5e4] ss:$8 sps:$4 sm:$0xff]  }
 0x216   : > { %4105 = vmatpush1.bf16.msra.mxu0 %v6239_v33  ;;  %3828 = vmatprep.subr.bf16.mxu1 %v6246_v34  ;;  %v6335_v33 = vld [vmem:[%s7167_s16 + $0xce4] ss:$8 sps:$4 sm:$0xff]   ;;  %v6330_v34 = vld [vmem:[%s7167_s16 + $0x5e0] ss:$8 sps:$4 sm:$0xff]  }
 0x217   : > { %4115 = vmatprep.subr.bf16.mxu0 %v6251_v35  ;;  %v6333_v35 = vld [vmem:[%s7167_s16 + $0xce0] ss:$8 sps:$4 sm:$0xff]  }
 0x218   : > { %3820 = vmatmul.mubr.bf16.vlgmr.msra.gmra.mrb[0].mxu1 %v4991_v37  ;;  %v6336_v37 = vld [vmem:[%s7167_s16 + $0x5f0] ss:$8 sps:$4 sm:$0xff]  }
 0x219   : > { %4107 = vmatmul.mubr.bf16.vlgmr.msra.gmra.mrb[0].mxu0 %v5005_v38  ;;  %3829 = vmatpush1.bf16.msra.mxu1 %v6244_v27  ;;  %v6338_v27 = vld [vmem:[%s7167_s16 + $0x5f4] ss:$8 sps:$4 sm:$0xff]   ;;  %v6339_v38 = vld [vmem:[%s7167_s16 + $0xcf0] ss:$8 sps:$4 sm:$0xff]  }
 0x21a   : > { %4116 = vmatpush1.bf16.msra.mxu0 %v6249_v36  ;;  %3830 = vmatprep.subr.bf16.mxu1 %v6254_v40  ;;  %v6341_v36 = vld [vmem:[%s7167_s16 + $0xcf4] ss:$8 sps:$4 sm:$0xff]   ;;  %v6346_v40 = vld [vmem:[%s7167_s16 + $0x604] ss:$8 sps:$4 sm:$0xff]  }
 0x21b   : > { %4117 = vmatprep.subr.bf16.mxu0 %v6257_v41  ;;  %3860 = vmatprep.mubr.bf16.mxu1 %v4994_v20  ;;  %v6351_v41 = vld [vmem:[%s7167_s16 + $0xd04] ss:$8 sps:$4 sm:$0xff]   ;;  %v7637_v20 = vld [vmem:[#allocation4 + $0x30] sm:$0xff] }
 0x21c   : > { %4147 = vmatprep.mubr.bf16.mxu0 %v5008_v31  ;;  %v7639_v31 = vld [vmem:[#allocation4 + $0x68] sm:$0xff] }
 0x21d   : > { %3831 = vmatpush1.bf16.msra.mxu1 %v6252_v42  ;;  %v4993_v42 = vcombine.low %v7557_v26, %v7557_v26  ;;  %v4996_v26 = vcombine.high %v7637_v20, %v7637_v20 }
 0x21e   : > { %4118 = vmatpush1.bf16.msra.mxu0 %v6255_v43  ;;  %3832 = vmatprep.subr.bf16.mxu1 %v6260_v44  ;;  %v5007_v43 = vcombine.low %v7565_v39, %v7565_v39  ;;  %v6344_v44 = vld [vmem:[%s7167_s16 + $0x600] ss:$8 sps:$4 sm:$0xff]   ;;  %v5010_v39 = vcombine.high %v7639_v31, %v7639_v31 }
 0x21f   : > { %4119 = vmatprep.subr.bf16.mxu0 %v6263_v45  ;;  %v6349_v45 = vld [vmem:[%s7167_s16 + $0xd00] ss:$8 sps:$4 sm:$0xff]  }
 0x221   : > { %3833 = vmatpush1.bf16.msra.mxu1 %v6258_v46  ;;  %v6354_v46 = vld [vmem:[%s7167_s16 + $0x614] ss:$8 sps:$4 sm:$0xff]  }
 0x222   : > { %4120 = vmatpush1.bf16.msra.mxu0 %v6261_v47  ;;  %3834 = vmatprep.subr.bf16.mxu1 %v6266_v48  ;;  %v6357_v47 = vld [vmem:[%s7167_s16 + $0xd14] ss:$8 sps:$4 sm:$0xff]   ;;  %v6352_v48 = vld [vmem:[%s7167_s16 + $0x610] ss:$8 sps:$4 sm:$0xff]  }
 0x223   : > { %4121 = vmatprep.subr.bf16.mxu0 %v6269_v49  ;;  %v6355_v49 = vld [vmem:[%s7167_s16 + $0xd10] ss:$8 sps:$4 sm:$0xff]  }
 0x225   : > { %3835 = vmatpush1.bf16.msra.mxu1 %v6264_v50  ;;  %v6360_v50 = vld [vmem:[%s7167_s16 + $0x624] ss:$8 sps:$4 sm:$0xff]  }
 0x226   : > { %4122 = vmatpush1.bf16.msra.mxu0 %v6267_v51  ;;  %3836 = vmatprep.subr.bf16.mxu1 %v6272_v52  ;;  %v6363_v51 = vld [vmem:[%s7167_s16 + $0xd24] ss:$8 sps:$4 sm:$0xff]   ;;  %v6358_v52 = vld [vmem:[%s7167_s16 + $0x620] ss:$8 sps:$4 sm:$0xff]  }
 0x227   : > { %4123 = vmatprep.subr.bf16.mxu0 %v6275_v53  ;;  %v6361_v53 = vld [vmem:[%s7167_s16 + $0xd20] ss:$8 sps:$4 sm:$0xff]  }
 0x229   : > { %3837 = vmatpush1.bf16.msra.mxu1 %v6270_v54  ;;  %v6366_v54 = vld [vmem:[%s7167_s16 + $0x634] ss:$8 sps:$4 sm:$0xff]  }
 0x22a   : > { %4124 = vmatpush1.bf16.msra.mxu0 %v6273_v55  ;;  %3838 = vmatprep.subr.bf16.mxu1 %v6278_v56  ;;  %v6369_v55 = vld [vmem:[%s7167_s16 + $0xd34] ss:$8 sps:$4 sm:$0xff]   ;;  %v6364_v56 = vld [vmem:[%s7167_s16 + $0x630] ss:$8 sps:$4 sm:$0xff]  }
 0x22b   : > { %4125 = vmatprep.subr.bf16.mxu0 %v6281_v57  ;;  %v6367_v57 = vld [vmem:[%s7167_s16 + $0xd30] ss:$8 sps:$4 sm:$0xff]  }
 0x22d   : > { %3839 = vmatpush1.bf16.msra.mxu1 %v6276_v58  ;;  %v6372_v58 = vld [vmem:[%s7167_s16 + $0x644] ss:$8 sps:$4 sm:$0xff]  }
 0x22e   : > { %4126 = vmatpush1.bf16.msra.mxu0 %v6279_v59  ;;  %3840 = vmatprep.subr.bf16.mxu1 %v6284_v60  ;;  %v6375_v59 = vld [vmem:[%s7167_s16 + $0xd44] ss:$8 sps:$4 sm:$0xff]   ;;  %v6370_v60 = vld [vmem:[%s7167_s16 + $0x640] ss:$8 sps:$4 sm:$0xff]  }
 0x22f   : > { %4127 = vmatprep.subr.bf16.mxu0 %v6287_v61  ;;  %v6373_v61 = vld [vmem:[%s7167_s16 + $0xd40] ss:$8 sps:$4 sm:$0xff]  }
 0x231   : > { %3841 = vmatpush1.bf16.msra.mxu1 %v6282_v62  ;;  %v6378_v62 = vld [vmem:[%s7167_s16 + $0x654] ss:$8 sps:$4 sm:$0xff]  }
 0x232   : > { %4128 = vmatpush1.bf16.msra.mxu0 %v6285_v63  ;;  %3842 = vmatprep.subr.bf16.mxu1 %v6290_v0  ;;  %v6381_v63 = vld [vmem:[%s7167_s16 + $0xd54] ss:$8 sps:$4 sm:$0xff]   ;;  %v6376_v0 = vld [vmem:[%s7167_s16 + $0x650] ss:$8 sps:$4 sm:$0xff]  }
 0x233   : > { %4129 = vmatprep.subr.bf16.mxu0 %v6293_v1  ;;  %v6379_v1 = vld [vmem:[%s7167_s16 + $0xd50] ss:$8 sps:$4 sm:$0xff]  }
 0x235   : > { %3843 = vmatpush1.bf16.msra.mxu1 %v6288_v2  ;;  %v6384_v2 = vld [vmem:[%s7167_s16 + $0x664] ss:$8 sps:$4 sm:$0xff]  }
 0x236   : > { %4130 = vmatpush1.bf16.msra.mxu0 %v6291_v3  ;;  %3844 = vmatprep.subr.bf16.mxu1 %v6296_v4  ;;  %v6387_v3 = vld [vmem:[%s7167_s16 + $0xd64] ss:$8 sps:$4 sm:$0xff]   ;;  %v6382_v4 = vld [vmem:[%s7167_s16 + $0x660] ss:$8 sps:$4 sm:$0xff]  }
 0x237   : > { %4131 = vmatprep.subr.bf16.mxu0 %v6299_v5  ;;  %v6385_v5 = vld [vmem:[%s7167_s16 + $0xd60] ss:$8 sps:$4 sm:$0xff]  }
 0x239   : > { %3845 = vmatpush1.bf16.msra.mxu1 %v6294_v6  ;;  %v6390_v6 = vld [vmem:[%s7167_s16 + $0x674] ss:$8 sps:$4 sm:$0xff]  }
 0x23a   : > { %4132 = vmatpush1.bf16.msra.mxu0 %v6297_v7  ;;  %3846 = vmatprep.subr.bf16.mxu1 %v6302_v8  ;;  %v6393_v7 = vld [vmem:[%s7167_s16 + $0xd74] ss:$8 sps:$4 sm:$0xff]   ;;  %v6388_v8 = vld [vmem:[%s7167_s16 + $0x670] ss:$8 sps:$4 sm:$0xff]  }
 0x23b   : > { %4133 = vmatprep.subr.bf16.mxu0 %v6305_v9  ;;  %v6391_v9 = vld [vmem:[%s7167_s16 + $0xd70] ss:$8 sps:$4 sm:$0xff]  }
 0x23d   : > { %3847 = vmatpush1.bf16.msra.mxu1 %v6300_v10  ;;  %v6396_v10 = vld [vmem:[%s7167_s16 + $0x684] ss:$8 sps:$4 sm:$0xff]  }
 0x23e   : > { %4134 = vmatpush1.bf16.msra.mxu0 %v6303_v11  ;;  %3848 = vmatprep.subr.bf16.mxu1 %v6308_v12  ;;  %v6399_v11 = vld [vmem:[%s7167_s16 + $0xd84] ss:$8 sps:$4 sm:$0xff]   ;;  %v6394_v12 = vld [vmem:[%s7167_s16 + $0x680] ss:$8 sps:$4 sm:$0xff]  }
 0x23f   : > { %4135 = vmatprep.subr.bf16.mxu0 %v6311_v13  ;;  %v6397_v13 = vld [vmem:[%s7167_s16 + $0xd80] ss:$8 sps:$4 sm:$0xff]  }
 0x241   : > { %3849 = vmatpush1.bf16.msra.mxu1 %v6306_v14  ;;  %v6402_v14 = vld [vmem:[%s7167_s16 + $0x694] ss:$8 sps:$4 sm:$0xff]  }
 0x242   : > { %4136 = vmatpush1.bf16.msra.mxu0 %v6309_v15  ;;  %3850 = vmatprep.subr.bf16.mxu1 %v6314_v16  ;;  %v6405_v15 = vld [vmem:[%s7167_s16 + $0xd94] ss:$8 sps:$4 sm:$0xff]   ;;  %v6400_v16 = vld [vmem:[%s7167_s16 + $0x690] ss:$8 sps:$4 sm:$0xff]  }
 0x243   : > { %4137 = vmatprep.subr.bf16.mxu0 %v6317_v17  ;;  %v6403_v17 = vld [vmem:[%s7167_s16 + $0xd90] ss:$8 sps:$4 sm:$0xff]  }
 0x245   : > { %3851 = vmatpush1.bf16.msra.mxu1 %v6312_v18  ;;  %v6408_v18 = vld [vmem:[%s7167_s16 + $0x6a4] ss:$8 sps:$4 sm:$0xff]  }
 0x246   : > { %4138 = vmatpush1.bf16.msra.mxu0 %v6315_v19  ;;  %3852 = vmatprep.subr.bf16.mxu1 %v6320_v21  ;;  %v6411_v19 = vld [vmem:[%s7167_s16 + $0xda4] ss:$8 sps:$4 sm:$0xff]   ;;  %v6406_v21 = vld [vmem:[%s7167_s16 + $0x6a0] ss:$8 sps:$4 sm:$0xff]  }
 0x247   : > { %4139 = vmatprep.subr.bf16.mxu0 %v6323_v23  ;;  %v6409_v23 = vld [vmem:[%s7167_s16 + $0xda0] ss:$8 sps:$4 sm:$0xff]  }
 0x249   : > { %3853 = vmatpush1.bf16.msra.mxu1 %v6318_v24  ;;  %v6414_v24 = vld [vmem:[%s7167_s16 + $0x6b4] ss:$8 sps:$4 sm:$0xff]  }
 0x24a   : > { %4140 = vmatpush1.bf16.msra.mxu0 %v6321_v25  ;;  %3854 = vmatprep.subr.bf16.mxu1 %v6326_v28  ;;  %v6417_v25 = vld [vmem:[%s7167_s16 + $0xdb4] ss:$8 sps:$4 sm:$0xff]   ;;  %v6412_v28 = vld [vmem:[%s7167_s16 + $0x6b0] ss:$8 sps:$4 sm:$0xff]  }
 0x24b   : > { %4141 = vmatprep.subr.bf16.mxu0 %v6329_v29  ;;  %v6415_v29 = vld [vmem:[%s7167_s16 + $0xdb0] ss:$8 sps:$4 sm:$0xff]  }
 0x24d   : > { %3855 = vmatpush1.bf16.msra.mxu1 %v6324_v22  ;;  %v6420_v22 = vld [vmem:[%s7167_s16 + $0x6c4] ss:$8 sps:$4 sm:$0xff]  }
 0x24e   : > { %4142 = vmatpush1.bf16.msra.mxu0 %v6327_v30  ;;  %3856 = vmatprep.subr.bf16.mxu1 %v6332_v32  ;;  %v6423_v30 = vld [vmem:[%s7167_s16 + $0xdc4] ss:$8 sps:$4 sm:$0xff]   ;;  %v6418_v32 = vld [vmem:[%s7167_s16 + $0x6c0] ss:$8 sps:$4 sm:$0xff]  }
 0x24f   : > { %4143 = vmatprep.subr.bf16.mxu0 %v6335_v33  ;;  %v6421_v33 = vld [vmem:[%s7167_s16 + $0xdc0] ss:$8 sps:$4 sm:$0xff]  }
 0x251   : > { %3857 = vmatpush1.bf16.msra.mxu1 %v6330_v34  ;;  %v6426_v34 = vld [vmem:[%s7167_s16 + $0x6d4] ss:$8 sps:$4 sm:$0xff]  }
 0x252   : > { %4144 = vmatpush1.bf16.msra.mxu0 %v6333_v35  ;;  %3858 = vmatprep.subr.bf16.mxu1 %v6338_v27  ;;  %v6429_v35 = vld [vmem:[%s7167_s16 + $0xdd4] ss:$8 sps:$4 sm:$0xff]   ;;  %v6424_v27 = vld [vmem:[%s7167_s16 + $0x6d0] ss:$8 sps:$4 sm:$0xff]  }
 0x253   : > { %4145 = vmatprep.subr.bf16.mxu0 %v6341_v36  ;;  %v6427_v36 = vld [vmem:[%s7167_s16 + $0xdd0] ss:$8 sps:$4 sm:$0xff]  }
 0x255   : > { %3859 = vmatpush1.bf16.msra.mxu1 %v6336_v37  ;;  %v6432_v37 = vld [vmem:[%s7167_s16 + $0x6e4] ss:$8 sps:$4 sm:$0xff]  }
 0x256   : > { %4146 = vmatpush1.bf16.msra.mxu0 %v6339_v38  ;;  %3869 = vmatprep.subr.bf16.mxu1 %v6346_v40  ;;  %v6435_v38 = vld [vmem:[%s7167_s16 + $0xde4] ss:$8 sps:$4 sm:$0xff]   ;;  %v6430_v40 = vld [vmem:[%s7167_s16 + $0x6e0] ss:$8 sps:$4 sm:$0xff]  }
 0x257   : > { %4156 = vmatprep.subr.bf16.mxu0 %v6351_v41  ;;  %v6433_v41 = vld [vmem:[%s7167_s16 + $0xde0] ss:$8 sps:$4 sm:$0xff]  }
 0x258   : > { %3861 = vmatmul.mubr.bf16.vlgmr.msra.gmra.mrb[0].mxu1 %v4993_v42  ;;  %v6438_v42 = vld [vmem:[%s7167_s16 + $0x6f4] ss:$8 sps:$4 sm:$0xff]  }
 0x259   : > { %4148 = vmatmul.mubr.bf16.vlgmr.msra.gmra.mrb[0].mxu0 %v5007_v43  ;;  %3870 = vmatpush1.bf16.msra.mxu1 %v6344_v44  ;;  %v6441_v43 = vld [vmem:[%s7167_s16 + $0xdf4] ss:$8 sps:$4 sm:$0xff]   ;;  %v6436_v44 = vld [vmem:[%s7167_s16 + $0x6f0] ss:$8 sps:$4 sm:$0xff]  }
 0x25a   : > { %4157 = vmatpush1.bf16.msra.mxu0 %v6349_v45  ;;  %3871 = vmatprep.subr.bf16.mxu1 %v6354_v46  ;;  %v6439_v45 = vld [vmem:[%s7167_s16 + $0xdf0] ss:$8 sps:$4 sm:$0xff]   ;;  %v6448_v46 = vld [vmem:[%s7167_s16 + $0xe04] ss:$8 sps:$4 sm:$0xff]  }
 0x25b   : > { %4158 = vmatprep.subr.bf16.mxu0 %v6357_v47  ;;  %3901 = vmatprep.mubr.bf16.mxu1 %v4996_v26  ;;  %v7708_v47 = vld [vmem:[#allocation4 + $0x70] sm:$0xff]  ;;  %v4995_v26 = vcombine.low %v7637_v20, %v7637_v20 }
 0x25c   : > { %4188 = vmatprep.mubr.bf16.mxu0 %v5010_v39  ;;  %v5009_v39 = vcombine.low %v7639_v31, %v7639_v31  ;;  %v6449_v20 = vld [vmem:[%s7167_s16 + $0xe10] ss:$8 sps:$4 sm:$0xff]   ;;  %v6454_v31 = vld [vmem:[%s7167_s16 + $0xe24] ss:$8 sps:$4 sm:$0xff]  }
 0x25d   : > { %3872 = vmatpush1.bf16.msra.mxu1 %v6352_v48  ;;  %v6446_v48 = vld [vmem:[%s7167_s16 + $0xe00] ss:$8 sps:$4 sm:$0xff]  }
 0x25e   : > { %4159 = vmatpush1.bf16.msra.mxu0 %v6355_v49  ;;  %3873 = vmatprep.subr.bf16.mxu1 %v6360_v50  ;;  %v5012_v49 = vcombine.high %v7708_v47, %v7708_v47  ;;  %v6451_v50 = vld [vmem:[%s7167_s16 + $0xe14] ss:$8 sps:$4 sm:$0xff]  }
 0x25f   : > { %4160 = vmatprep.subr.bf16.mxu0 %v6363_v51  ;;  %v6452_v51 = vld [vmem:[%s7167_s16 + $0xe20] ss:$8 sps:$4 sm:$0xff]  }
 0x261   : > { %3874 = vmatpush1.bf16.msra.mxu1 %v6358_v52  ;;  %v6457_v52 = vld [vmem:[%s7167_s16 + $0xe34] ss:$8 sps:$4 sm:$0xff]  }
 0x262   : > { %4161 = vmatpush1.bf16.msra.mxu0 %v6361_v53  ;;  %3875 = vmatprep.subr.bf16.mxu1 %v6366_v54  ;;  %v6455_v53 = vld [vmem:[%s7167_s16 + $0xe30] ss:$8 sps:$4 sm:$0xff]   ;;  %v6460_v54 = vld [vmem:[%s7167_s16 + $0xe44] ss:$8 sps:$4 sm:$0xff]  }
 0x263   : > { %4162 = vmatprep.subr.bf16.mxu0 %v6369_v55  ;;  %v6458_v55 = vld [vmem:[%s7167_s16 + $0xe40] ss:$8 sps:$4 sm:$0xff]  }
 0x265   : > { %3876 = vmatpush1.bf16.msra.mxu1 %v6364_v56  ;;  %v6463_v56 = vld [vmem:[%s7167_s16 + $0xe54] ss:$8 sps:$4 sm:$0xff]  }
 0x266   : > { %4163 = vmatpush1.bf16.msra.mxu0 %v6367_v57  ;;  %3877 = vmatprep.subr.bf16.mxu1 %v6372_v58  ;;  %v6461_v57 = vld [vmem:[%s7167_s16 + $0xe50] ss:$8 sps:$4 sm:$0xff]   ;;  %v6466_v58 = vld [vmem:[%s7167_s16 + $0xe64] ss:$8 sps:$4 sm:$0xff]  }
 0x267   : > { %4164 = vmatprep.subr.bf16.mxu0 %v6375_v59  ;;  %v6464_v59 = vld [vmem:[%s7167_s16 + $0xe60] ss:$8 sps:$4 sm:$0xff]  }
 0x269   : > { %3878 = vmatpush1.bf16.msra.mxu1 %v6370_v60  ;;  %v6469_v60 = vld [vmem:[%s7167_s16 + $0xe74] ss:$8 sps:$4 sm:$0xff]  }
 0x26a   : > { %4165 = vmatpush1.bf16.msra.mxu0 %v6373_v61  ;;  %3879 = vmatprep.subr.bf16.mxu1 %v6378_v62  ;;  %v6467_v61 = vld [vmem:[%s7167_s16 + $0xe70] ss:$8 sps:$4 sm:$0xff]   ;;  %v6472_v62 = vld [vmem:[%s7167_s16 + $0xe84] ss:$8 sps:$4 sm:$0xff]  }
 0x26b   : > { %4166 = vmatprep.subr.bf16.mxu0 %v6381_v63  ;;  %v6470_v63 = vld [vmem:[%s7167_s16 + $0xe80] ss:$8 sps:$4 sm:$0xff]  }
 0x26d   : > { %3880 = vmatpush1.bf16.msra.mxu1 %v6376_v0  ;;  %v6475_v0 = vld [vmem:[%s7167_s16 + $0xe94] ss:$8 sps:$4 sm:$0xff]  }
 0x26e   : > { %4167 = vmatpush1.bf16.msra.mxu0 %v6379_v1  ;;  %3881 = vmatprep.subr.bf16.mxu1 %v6384_v2  ;;  %v6473_v1 = vld [vmem:[%s7167_s16 + $0xe90] ss:$8 sps:$4 sm:$0xff]   ;;  %v6478_v2 = vld [vmem:[%s7167_s16 + $0xea4] ss:$8 sps:$4 sm:$0xff]  }
 0x26f   : > { %4168 = vmatprep.subr.bf16.mxu0 %v6387_v3  ;;  %v6476_v3 = vld [vmem:[%s7167_s16 + $0xea0] ss:$8 sps:$4 sm:$0xff]  }
 0x271   : > { %3882 = vmatpush1.bf16.msra.mxu1 %v6382_v4  ;;  %v6481_v4 = vld [vmem:[%s7167_s16 + $0xeb4] ss:$8 sps:$4 sm:$0xff]  }
 0x272   : > { %4169 = vmatpush1.bf16.msra.mxu0 %v6385_v5  ;;  %3883 = vmatprep.subr.bf16.mxu1 %v6390_v6  ;;  %v6479_v5 = vld [vmem:[%s7167_s16 + $0xeb0] ss:$8 sps:$4 sm:$0xff]   ;;  %v6484_v6 = vld [vmem:[%s7167_s16 + $0xec4] ss:$8 sps:$4 sm:$0xff]  }
 0x273   : > { %4170 = vmatprep.subr.bf16.mxu0 %v6393_v7  ;;  %v6482_v7 = vld [vmem:[%s7167_s16 + $0xec0] ss:$8 sps:$4 sm:$0xff]  }
 0x275   : > { %3884 = vmatpush1.bf16.msra.mxu1 %v6388_v8  ;;  %v6487_v8 = vld [vmem:[%s7167_s16 + $0xed4] ss:$8 sps:$4 sm:$0xff]  }
 0x276   : > { %4171 = vmatpush1.bf16.msra.mxu0 %v6391_v9  ;;  %3885 = vmatprep.subr.bf16.mxu1 %v6396_v10  ;;  %v6485_v9 = vld [vmem:[%s7167_s16 + $0xed0] ss:$8 sps:$4 sm:$0xff]   ;;  %v6490_v10 = vld [vmem:[%s7167_s16 + $0xee4] ss:$8 sps:$4 sm:$0xff]  }
 0x277   : > { %4172 = vmatprep.subr.bf16.mxu0 %v6399_v11  ;;  %v6488_v11 = vld [vmem:[%s7167_s16 + $0xee0] ss:$8 sps:$4 sm:$0xff]  }
 0x279   : > { %3886 = vmatpush1.bf16.msra.mxu1 %v6394_v12  ;;  %v6493_v12 = vld [vmem:[%s7167_s16 + $0xef4] ss:$8 sps:$4 sm:$0xff]  }
 0x27a   : > { %4173 = vmatpush1.bf16.msra.mxu0 %v6397_v13  ;;  %3887 = vmatprep.subr.bf16.mxu1 %v6402_v14  ;;  %v6491_v13 = vld [vmem:[%s7167_s16 + $0xef0] ss:$8 sps:$4 sm:$0xff]   ;;  %v6498_v14 = vld [vmem:[%s7167_s16 + $0xf04] ss:$8 sps:$4 sm:$0xff]  }
 0x27b   : > { %4174 = vmatprep.subr.bf16.mxu0 %v6405_v15  ;;  %v7748_v15 = vld [vmem:[#allocation4 + $0x78] sm:$0xff] }
 0x27d   : > { %3888 = vmatpush1.bf16.msra.mxu1 %v6400_v16  ;;  %v5011_v16 = vcombine.low %v7708_v47, %v7708_v47  ;;  %v6523_v47 = vld [vmem:[%s7167_s16 + $0xf90] ss:$8 sps:$4 sm:$0xff]  }
 0x27e   : > { %4175 = vmatpush1.bf16.msra.mxu0 %v6403_v17  ;;  %3889 = vmatprep.subr.bf16.mxu1 %v6408_v18  ;;  %v6496_v17 = vld [vmem:[%s7167_s16 + $0xf00] ss:$8 sps:$4 sm:$0xff]   ;;  %v5014_v18 = vcombine.high %v7748_v15, %v7748_v15 }
 0x27f   : > { %4176 = vmatprep.subr.bf16.mxu0 %v6411_v19  ;;  %v6501_v19 = vld [vmem:[%s7167_s16 + $0xf14] ss:$8 sps:$4 sm:$0xff]  }
 0x281   : > { %3890 = vmatpush1.bf16.msra.mxu1 %v6406_v21  ;;  %v6499_v21 = vld [vmem:[%s7167_s16 + $0xf10] ss:$8 sps:$4 sm:$0xff]  }
 0x282   : > { %4177 = vmatpush1.bf16.msra.mxu0 %v6409_v23  ;;  %3891 = vmatprep.subr.bf16.mxu1 %v6414_v24  ;;  %v6504_v23 = vld [vmem:[%s7167_s16 + $0xf24] ss:$8 sps:$4 sm:$0xff]   ;;  %v6502_v24 = vld [vmem:[%s7167_s16 + $0xf20] ss:$8 sps:$4 sm:$0xff]  }
 0x283   : > { %4178 = vmatprep.subr.bf16.mxu0 %v6417_v25  ;;  %v6507_v25 = vld [vmem:[%s7167_s16 + $0xf34] ss:$8 sps:$4 sm:$0xff]  }
 0x285   : > { %3892 = vmatpush1.bf16.msra.mxu1 %v6412_v28  ;;  %v6505_v28 = vld [vmem:[%s7167_s16 + $0xf30] ss:$8 sps:$4 sm:$0xff]  }
 0x286   : > { %4179 = vmatpush1.bf16.msra.mxu0 %v6415_v29  ;;  %3893 = vmatprep.subr.bf16.mxu1 %v6420_v22  ;;  %v6510_v29 = vld [vmem:[%s7167_s16 + $0xf44] ss:$8 sps:$4 sm:$0xff]   ;;  %v6508_v22 = vld [vmem:[%s7167_s16 + $0xf40] ss:$8 sps:$4 sm:$0xff]  }
 0x287   : > { %4180 = vmatprep.subr.bf16.mxu0 %v6423_v30  ;;  %v6513_v30 = vld [vmem:[%s7167_s16 + $0xf54] ss:$8 sps:$4 sm:$0xff]  }
 0x289   : > { %3894 = vmatpush1.bf16.msra.mxu1 %v6418_v32  ;;  %v6511_v32 = vld [vmem:[%s7167_s16 + $0xf50] ss:$8 sps:$4 sm:$0xff]  }
 0x28a   : > { %4181 = vmatpush1.bf16.msra.mxu0 %v6421_v33  ;;  %3895 = vmatprep.subr.bf16.mxu1 %v6426_v34  ;;  %v6516_v33 = vld [vmem:[%s7167_s16 + $0xf64] ss:$8 sps:$4 sm:$0xff]   ;;  %v6514_v34 = vld [vmem:[%s7167_s16 + $0xf60] ss:$8 sps:$4 sm:$0xff]  }
 0x28b   : > { %4182 = vmatprep.subr.bf16.mxu0 %v6429_v35  ;;  %v6519_v35 = vld [vmem:[%s7167_s16 + $0xf74] ss:$8 sps:$4 sm:$0xff]  }
 0x28d   : > { %3896 = vmatpush1.bf16.msra.mxu1 %v6424_v27  ;;  %v6546_v27 = vld [vmem:[%s7175_s17] ss:$16 sps:$4 sm:$0xff]  }
 0x28e   : > { %4183 = vmatpush1.bf16.msra.mxu0 %v6427_v36  ;;  %3897 = vmatprep.subr.bf16.mxu1 %v6432_v37  ;;  %v6548_v36 = vld [vmem:[%s7175_s17 + $0x4] ss:$16 sps:$4 sm:$0xff]  }
 0x28f   : > { %4184 = vmatprep.subr.bf16.mxu0 %v6435_v38  ;;  %v6551_v37 = vld [vmem:[%s7175_s17 + $0x24] ss:$16 sps:$4 sm:$0xff]  }
 0x290   : > { %v6517_v38 = vld [vmem:[%s7167_s16 + $0xf70] ss:$8 sps:$4 sm:$0xff]  }
 0x291   : > { %3898 = vmatpush1.bf16.msra.mxu1 %v6430_v40  ;;  %v6549_v40 = vld [vmem:[%s7175_s17 + $0x20] ss:$16 sps:$4 sm:$0xff]  }
 0x292   : > { %4185 = vmatpush1.bf16.msra.mxu0 %v6433_v41  ;;  %3899 = vmatprep.subr.bf16.mxu1 %v6438_v42  ;;  %v6522_v41 = vld [vmem:[%s7167_s16 + $0xf84] ss:$8 sps:$4 sm:$0xff]   ;;  %v6554_v42 = vld [vmem:[%s7175_s17 + $0x44] ss:$16 sps:$4 sm:$0xff]  }
 0x293   : > { %4186 = vmatprep.subr.bf16.mxu0 %v6441_v43  ;;  %v6520_v43 = vld [vmem:[%s7167_s16 + $0xf80] ss:$8 sps:$4 sm:$0xff]  }
 0x295   : > { %3900 = vmatpush1.bf16.msra.mxu1 %v6436_v44  ;;  %v6552_v44 = vld [vmem:[%s7175_s17 + $0x40] ss:$16 sps:$4 sm:$0xff]  }
 0x296   : > { %4187 = vmatpush1.bf16.msra.mxu0 %v6439_v45  ;;  %4671 = vmatprep.subr.bf16.mxu1 %v6548_v36  ;;  %v6525_v45 = vld [vmem:[%s7167_s16 + $0xf94] ss:$8 sps:$4 sm:$0xff]  }
 0x297   : > { %4197 = vmatprep.subr.bf16.mxu0 %v6448_v46  ;;  %v6557_v46 = vld [vmem:[%s7175_s17 + $0x64] ss:$16 sps:$4 sm:$0xff]  }
 0x298   : > { %3902 = vmatmul.mubr.bf16.vlgmr.msra.gmra.mrb[0].mxu1 %v4995_v26  ;;  %v6555_v26 = vld [vmem:[%s7175_s17 + $0x60] ss:$16 sps:$4 sm:$0xff]  }
 0x299   : > { %4189 = vmatmul.mubr.bf16.vlgmr.msra.gmra.mrb[0].mxu0 %v5009_v39  ;;  %4672 = vmatpush1.bf16.msra.mxu1 %v6546_v27  ;;  %v6528_v39 = vld [vmem:[%s7167_s16 + $0xfa4] ss:$8 sps:$4 sm:$0xff]  }
 0x29a   : > { %4198 = vmatpush1.bf16.msra.mxu0 %v6446_v48  ;;  %4229 = vmatprep.mubr.bf16.mxu0 %v5012_v49  ;;  %v6560_v48 = vld [vmem:[%s7175_s17 + $0x84] ss:$16 sps:$4 sm:$0xff]  }
 0x29b   : > { %4199 = vmatprep.subr.bf16.mxu0 %v6451_v50  ;;  %4673 = vmatprep.subr.bf16.mxu1 %v6551_v37  ;;  %v6526_v49 = vld [vmem:[%s7167_s16 + $0xfa0] ss:$8 sps:$4 sm:$0xff]   ;;  %v6558_v50 = vld [vmem:[%s7175_s17 + $0x80] ss:$16 sps:$4 sm:$0xff]  }
 0x29d   : > { %4674 = vmatpush1.bf16.msra.mxu1 %v6549_v40 }
 0x29e   : > { %4200 = vmatpush1.bf16.msra.mxu0 %v6449_v20  ;;  %4675 = vmatprep.subr.bf16.mxu1 %v6554_v42  ;;  %v6531_v20 = vld [vmem:[%s7167_s16 + $0xfb4] ss:$8 sps:$4 sm:$0xff]  }
 0x29f   : > { %4201 = vmatprep.subr.bf16.mxu0 %v6454_v31  ;;  %v6563_v31 = vld [vmem:[%s7175_s17 + $0xa4] ss:$16 sps:$4 sm:$0xff]  }
 0x2a1   : > { %4676 = vmatpush1.bf16.msra.mxu1 %v6552_v44 }
 0x2a2   : > { %4202 = vmatpush1.bf16.msra.mxu0 %v6452_v51  ;;  %4677 = vmatprep.subr.bf16.mxu1 %v6557_v46  ;;  %v6529_v51 = vld [vmem:[%s7167_s16 + $0xfb0] ss:$8 sps:$4 sm:$0xff]  }
 0x2a3   : > { %4203 = vmatprep.subr.bf16.mxu0 %v6457_v52  ;;  %v6561_v52 = vld [vmem:[%s7175_s17 + $0xa0] ss:$16 sps:$4 sm:$0xff]  }
 0x2a5   : > { %4678 = vmatpush1.bf16.msra.mxu1 %v6555_v26  ;;  %v6597_v26 = vld [vmem:[%s7175_s17 + $0x28] ss:$16 sps:$4 sm:$0xff]  }
 0x2a6   : > { %4204 = vmatpush1.bf16.msra.mxu0 %v6455_v53  ;;  %4679 = vmatprep.subr.bf16.mxu1 %v6560_v48  ;;  %v6534_v53 = vld [vmem:[%s7167_s16 + $0xfc4] ss:$8 sps:$4 sm:$0xff]  }
 0x2a7   : > { %4205 = vmatprep.subr.bf16.mxu0 %v6460_v54  ;;  %v6566_v54 = vld [vmem:[%s7175_s17 + $0xc4] ss:$16 sps:$4 sm:$0xff]   ;;  %v6600_v48 = vld [vmem:[%s7175_s17 + $0x48] ss:$16 sps:$4 sm:$0xff]  }
 0x2a9   : > { %4680 = vmatpush1.bf16.msra.mxu1 %v6558_v50  ;;  %v6603_v50 = vld [vmem:[%s7175_s17 + $0x68] ss:$16 sps:$4 sm:$0xff]  }
 0x2aa   : > { %4206 = vmatpush1.bf16.msra.mxu0 %v6458_v55  ;;  %4681 = vmatprep.subr.bf16.mxu1 %v6563_v31  ;;  %v6532_v55 = vld [vmem:[%s7167_s16 + $0xfc0] ss:$8 sps:$4 sm:$0xff]   ;;  %v6606_v31 = vld [vmem:[%s7175_s17 + $0x88] ss:$16 sps:$4 sm:$0xff]  }
 0x2ab   : > { %4207 = vmatprep.subr.bf16.mxu0 %v6463_v56  ;;  %v6564_v56 = vld [vmem:[%s7175_s17 + $0xc0] ss:$16 sps:$4 sm:$0xff]  }
 0x2ad   : > { %4682 = vmatpush1.bf16.msra.mxu1 %v6561_v52  ;;  %v6609_v52 = vld [vmem:[%s7175_s17 + $0xa8] ss:$16 sps:$4 sm:$0xff]  }
 0x2ae   : > { %4208 = vmatpush1.bf16.msra.mxu0 %v6461_v57  ;;  %v6537_v57 = vld [vmem:[%s7167_s16 + $0xfd4] ss:$8 sps:$4 sm:$0xff]   ;;  %4683 = vmatprep.subr.bf16.mxu1 %v6566_v54 }
 0x2af   : > { %4209 = vmatprep.subr.bf16.mxu0 %v6466_v58  ;;  %v6569_v58 = vld [vmem:[%s7175_s17 + $0xe4] ss:$16 sps:$4 sm:$0xff]   ;;  %v6612_v54 = vld [vmem:[%s7175_s17 + $0xc8] ss:$16 sps:$4 sm:$0xff]  }
 0x2b1   : > { %4684 = vmatpush1.bf16.msra.mxu1 %v6564_v56  ;;  %v6615_v56 = vld [vmem:[%s7175_s17 + $0xe8] ss:$16 sps:$4 sm:$0xff]  }
 0x2b2   : > { %4210 = vmatpush1.bf16.msra.mxu0 %v6464_v59  ;;  %v6535_v59 = vld [vmem:[%s7167_s16 + $0xfd0] ss:$8 sps:$4 sm:$0xff]   ;;  %4685 = vmatprep.subr.bf16.mxu1 %v6569_v58  ;;  %v6618_v58 = vld [vmem:[%s7175_s17 + $0x108] ss:$16 sps:$4 sm:$0xff]  }
 0x2b3   : > { %4211 = vmatprep.subr.bf16.mxu0 %v6469_v60  ;;  %v6567_v60 = vld [vmem:[%s7175_s17 + $0xe0] ss:$16 sps:$4 sm:$0xff]  }
 0x2b5   : > { %4686 = vmatpush1.bf16.msra.mxu1 %v6567_v60  ;;  %v6621_v60 = vld [vmem:[%s7175_s17 + $0x128] ss:$16 sps:$4 sm:$0xff]  }
 0x2b6   : > { %4212 = vmatpush1.bf16.msra.mxu0 %v6467_v61  ;;  %v6540_v61 = vld [vmem:[%s7167_s16 + $0xfe4] ss:$8 sps:$4 sm:$0xff]  }
 0x2b7   : > { %4213 = vmatprep.subr.bf16.mxu0 %v6472_v62  ;;  %v6572_v62 = vld [vmem:[%s7175_s17 + $0x104] ss:$16 sps:$4 sm:$0xff]  }
 0x2b8   : > { %4687 = vmatprep.subr.bf16.mxu1 %v6572_v62  ;;  %v6624_v62 = vld [vmem:[%s7175_s17 + $0x148] ss:$16 sps:$4 sm:$0xff]  }
 0x2ba   : > { %4214 = vmatpush1.bf16.msra.mxu0 %v6470_v63  ;;  %v6538_v63 = vld [vmem:[%s7167_s16 + $0xfe0] ss:$8 sps:$4 sm:$0xff]  }
 0x2bb   : > { %4215 = vmatprep.subr.bf16.mxu0 %v6475_v0  ;;  %v6570_v0 = vld [vmem:[%s7175_s17 + $0x100] ss:$16 sps:$4 sm:$0xff]  }
 0x2bc   : > { %4688 = vmatpush1.bf16.msra.mxu1 %v6570_v0  ;;  %v6627_v0 = vld [vmem:[%s7175_s17 + $0x168] ss:$16 sps:$4 sm:$0xff]  }
 0x2be   : > { %4216 = vmatpush1.bf16.msra.mxu0 %v6473_v1  ;;  %v6543_v1 = vld [vmem:[%s7167_s16 + $0xff4] ss:$8 sps:$4 sm:$0xff]  }
 0x2bf   : > { %4217 = vmatprep.subr.bf16.mxu0 %v6478_v2  ;;  %v6575_v2 = vld [vmem:[%s7175_s17 + $0x124] ss:$16 sps:$4 sm:$0xff]  }
 0x2c0   : > { %4689 = vmatprep.subr.bf16.mxu1 %v6575_v2  ;;  %v6630_v2 = vld [vmem:[%s7175_s17 + $0x188] ss:$16 sps:$4 sm:$0xff]  }
 0x2c2   : > { %4218 = vmatpush1.bf16.msra.mxu0 %v6476_v3  ;;  %v6541_v3 = vld [vmem:[%s7167_s16 + $0xff0] ss:$8 sps:$4 sm:$0xff]  }
 0x2c3   : > { %4219 = vmatprep.subr.bf16.mxu0 %v6481_v4  ;;  %v6573_v4 = vld [vmem:[%s7175_s17 + $0x120] ss:$16 sps:$4 sm:$0xff]  }
 0x2c4   : > { %4690 = vmatpush1.bf16.msra.mxu1 %v6573_v4  ;;  %v6633_v4 = vld [vmem:[%s7175_s17 + $0x1a8] ss:$16 sps:$4 sm:$0xff]  }
 0x2c6   : > { %4220 = vmatpush1.bf16.msra.mxu0 %v6479_v5  ;;  %v6578_v5 = vld [vmem:[%s7175_s17 + $0x144] ss:$16 sps:$4 sm:$0xff]  }
 0x2c7   : > { %4221 = vmatprep.subr.bf16.mxu0 %v6484_v6  ;;  %v5013_v6 = vcombine.low %v7748_v15, %v7748_v15  ;;  %4691 = vmatprep.subr.bf16.mxu1 %v6578_v5  ;;  %v6588_v15 = vld [vmem:[%s7175_s17 + $0x1c0] ss:$16 sps:$4 sm:$0xff]   ;;  %v6638_v5 = vld [vmem:[%s7175_s17 + $0x1cc] ss:$16 sps:$4 sm:$0xff]  }
 0x2ca   : > { %4222 = vmatpush1.bf16.msra.mxu0 %v6482_v7  ;;  %v6576_v7 = vld [vmem:[%s7175_s17 + $0x140] ss:$16 sps:$4 sm:$0xff]  }
 0x2cb   : > { %4223 = vmatprep.subr.bf16.mxu0 %v6487_v8  ;;  %v6581_v8 = vld [vmem:[%s7175_s17 + $0x164] ss:$16 sps:$4 sm:$0xff]   ;;  %4692 = vmatpush1.bf16.msra.mxu1 %v6576_v7  ;;  %v6641_v7 = vld [vmem:[%s7175_s17 + $0x1ec] ss:$16 sps:$4 sm:$0xff]  }
 0x2cc   : > { %4693 = vmatprep.subr.bf16.mxu1 %v6581_v8  ;;  %v6639_v8 = vld [vmem:[%s7175_s17 + $0x1e8] ss:$16 sps:$4 sm:$0xff]  }
 0x2ce   : > { %4224 = vmatpush1.bf16.msra.mxu0 %v6485_v9  ;;  %v6579_v9 = vld [vmem:[%s7175_s17 + $0x160] ss:$16 sps:$4 sm:$0xff]  }
 0x2cf   : > { %4225 = vmatprep.subr.bf16.mxu0 %v6490_v10  ;;  %v6584_v10 = vld [vmem:[%s7175_s17 + $0x184] ss:$16 sps:$4 sm:$0xff]   ;;  %4694 = vmatpush1.bf16.msra.mxu1 %v6579_v9  ;;  %v4281_v9 = vld [vmem:[#allocation2] sm:$0xff] }
 0x2d0   : > { %4695 = vmatprep.subr.bf16.mxu1 %v6584_v10  ;;  %v4282_v10 = vld [vmem:[#allocation2 + $0x8] sm:$0xff] }
 0x2d2   : > { %4226 = vmatpush1.bf16.msra.mxu0 %v6488_v11  ;;  %v6582_v11 = vld [vmem:[%s7175_s17 + $0x180] ss:$16 sps:$4 sm:$0xff]  }
 0x2d3   : > { %4227 = vmatprep.subr.bf16.mxu0 %v6493_v12  ;;  %v6587_v12 = vld [vmem:[%s7175_s17 + $0x1a4] ss:$16 sps:$4 sm:$0xff]   ;;  %4696 = vmatpush1.bf16.msra.mxu1 %v6582_v11 }
 0x2d4   : > { %4697 = vmatprep.subr.bf16.mxu1 %v6587_v12 }
 0x2d6   : > { %4228 = vmatpush1.bf16.msra.mxu0 %v6491_v13  ;;  %v6585_v13 = vld [vmem:[%s7175_s17 + $0x1a0] ss:$16 sps:$4 sm:$0xff]  }
 0x2d7   : > { %4238 = vmatprep.subr.bf16.mxu0 %v6498_v14  ;;  %4698 = vmatpush1.bf16.msra.mxu1 %v6585_v13  ;;  %v6590_v14 = vld [vmem:[%s7175_s17 + $0x1c4] ss:$16 sps:$4 sm:$0xff]  }
 0x2d8   : > { %4699 = vmatprep.subr.bf16.mxu1 %v6590_v14 }
 0x2d9   : > { %4230 = vmatmul.mubr.bf16.vlgmr.msra.gmra.mrb[0].mxu0 %v5011_v16 }
 0x2da   : > { %4239 = vmatpush1.bf16.msra.mxu0 %v6496_v17  ;;  %4270 = vmatprep.mubr.bf16.mxu0 %v5014_v18 }
 0x2db   : > { %4240 = vmatprep.subr.bf16.mxu0 %v6501_v19  ;;  %4700 = vmatpush1.bf16.msra.mxu1 %v6588_v15  ;;  %v6593_v19 = vld [vmem:[%s7175_s17 + $0x1e4] ss:$16 sps:$4 sm:$0xff]  }
 0x2dc   : > { %4701 = vmatprep.subr.bf16.mxu1 %v6593_v19 }
 0x2de   : > { %4241 = vmatpush1.bf16.msra.mxu0 %v6499_v21 }
 0x2df   : > { %4242 = vmatprep.subr.bf16.mxu0 %v6504_v23  ;;  %v6591_v23 = vld [vmem:[%s7175_s17 + $0x1e0] ss:$16 sps:$4 sm:$0xff]  }
 0x2e0   : > { %4702 = vmatpush1.bf16.msra.mxu1 %v6591_v23 }
 0x2e2   : > { %4243 = vmatpush1.bf16.msra.mxu0 %v6502_v24  ;;  %v6596_v24 = vld [vmem:[%s7175_s17 + $0xc] ss:$16 sps:$4 sm:$0xff]  }
 0x2e3   : > { %4244 = vmatprep.subr.bf16.mxu0 %v6507_v25  ;;  %4712 = vmatprep.subr.bf16.mxu1 %v6596_v24  ;;  %v941_v25 = vlaneseq }
 0x2e6   : > { %4245 = vmatpush1.bf16.msra.mxu0 %v6505_v28  ;;  %v7820_v28 = vshrl.u32 %v941_v25, 7 }
 0x2e7   : > { %4246 = vmatprep.subr.bf16.mxu0 %v6510_v29 }
 0x2e8   : > { %v7823_v29 = vsub.s32 0, %v7820_v28 }
 0x2ea   : > { %4247 = vmatpush1.bf16.msra.mxu0 %v6508_v22  ;;  %v939_v22 = vld [vmem:[%s7173_s28] sm:$0x3] }
 0x2eb   : > { %4248 = vmatprep.subr.bf16.mxu0 %v6513_v30  ;;  %v7827_v30 = vsub.s32 1, %v7820_v28 }
 0x2ee   : > { %4249 = vmatpush1.bf16.msra.mxu0 %v6511_v32  ;;  %v944_v32 = vrot.slane %v939_v22, %v7823_v29 }
 0x2ef   : > { %4250 = vmatprep.subr.bf16.mxu0 %v6516_v33  ;;  %v948_v33 = vrot.slane %v939_v22, %v7827_v30 }
 0x2f2   : > { %4251 = vmatpush1.bf16.msra.mxu0 %v6514_v34 }
 0x2f3   : > { %4252 = vmatprep.subr.bf16.mxu0 %v6519_v35 }
 0x2f6   : > { %4253 = vmatpush1.bf16.msra.mxu0 %v6517_v38 }
 0x2f7   : > { %4254 = vmatprep.subr.bf16.mxu0 %v6522_v41 }
 0x2fa   : > { %4255 = vmatpush1.bf16.msra.mxu0 %v6520_v43 }
 0x2fb   : > { %4256 = vmatprep.subr.bf16.mxu0 %v6525_v45  ;;  %v6594_v45 = vld [vmem:[%s7175_s17 + $0x8] ss:$16 sps:$4 sm:$0xff]  }
 0x2fe   : > { %4257 = vmatpush1.bf16.msra.mxu0 %v6523_v47  ;;  %v6599_v47 = vld [vmem:[%s7175_s17 + $0x2c] ss:$16 sps:$4 sm:$0xff]  }
 0x2ff   : > { %4258 = vmatprep.subr.bf16.mxu0 %v6528_v39  ;;  %v6602_v39 = vld [vmem:[%s7175_s17 + $0x4c] ss:$16 sps:$4 sm:$0xff]  }
 0x302   : > { %4259 = vmatpush1.bf16.msra.mxu0 %v6526_v49  ;;  %v6605_v49 = vld [vmem:[%s7175_s17 + $0x6c] ss:$16 sps:$4 sm:$0xff]  }
 0x303   : > { %4260 = vmatprep.subr.bf16.mxu0 %v6531_v20  ;;  %v6608_v20 = vld [vmem:[%s7175_s17 + $0x8c] ss:$16 sps:$4 sm:$0xff]  }
 0x306   : > { %4261 = vmatpush1.bf16.msra.mxu0 %v6529_v51  ;;  %v6611_v51 = vld [vmem:[%s7175_s17 + $0xac] ss:$16 sps:$4 sm:$0xff]  }
 0x307   : > { %4262 = vmatprep.subr.bf16.mxu0 %v6534_v53  ;;  %v6614_v53 = vld [vmem:[%s7175_s17 + $0xcc] ss:$16 sps:$4 sm:$0xff]  }
 0x30a   : > { %4263 = vmatpush1.bf16.msra.mxu0 %v6532_v55  ;;  %v6617_v55 = vld [vmem:[%s7175_s17 + $0xec] ss:$16 sps:$4 sm:$0xff]  }
 0x30b   : > { %4264 = vmatprep.subr.bf16.mxu0 %v6537_v57  ;;  %v6620_v57 = vld [vmem:[%s7175_s17 + $0x10c] ss:$16 sps:$4 sm:$0xff]  }
 0x30e   : > { %4265 = vmatpush1.bf16.msra.mxu0 %v6535_v59  ;;  %v6623_v59 = vld [vmem:[%s7175_s17 + $0x12c] ss:$16 sps:$4 sm:$0xff]  }
 0x30f   : > { %4266 = vmatprep.subr.bf16.mxu0 %v6540_v61  ;;  %v6626_v61 = vld [vmem:[%s7175_s17 + $0x14c] ss:$16 sps:$4 sm:$0xff]  }
 0x312   : > { %4267 = vmatpush1.bf16.msra.mxu0 %v6538_v63  ;;  %v6629_v63 = vld [vmem:[%s7175_s17 + $0x16c] ss:$16 sps:$4 sm:$0xff]  }
 0x313   : > { %4268 = vmatprep.subr.bf16.mxu0 %v6543_v1  ;;  %v6632_v1 = vld [vmem:[%s7175_s17 + $0x18c] ss:$16 sps:$4 sm:$0xff]  }
 0x316   : > { %4269 = vmatpush1.bf16.msra.mxu0 %v6541_v3  ;;  %v6635_v3 = vld [vmem:[%s7175_s17 + $0x1ac] ss:$16 sps:$4 sm:$0xff]  }
 0x319   : > { %4271 = vmatmul.mubr.bf16.vlgmr.msra.gmra.mrb[0].mxu0 %v5013_v6  ;;  %v6636_v6 = vld [vmem:[%s7175_s17 + $0x1c8] ss:$16 sps:$4 sm:$0xff]  }
 0x36b   : > { %v3903_v16 = vpop.f32.mrb[0].mxu1 }
 0x36c   : > { %v3905_v17 = vpop.f32.mrb[1].mxu1  ;;  %v5600_v34 = vadd.f32 %v3903_v16, %v944_v32 }
 0x36d   : > { %v3907_v18 = vpop.f32.mrb[2].mxu1  ;;  %v5602_v35 = vadd.f32 %v3905_v17, %v948_v33  ;;  %v4283_v17 = vld [vmem:[#allocation2 + $0x10] sm:$0xff] }
 0x36e   : > { %v3908_v21 = vpop.f32.mrb[3].mxu1  ;;  %v4284_v18 = vld [vmem:[#allocation2 + $0x18] sm:$0xff] }
 0x3ec   : > { %v4272_v27 = vpop.f32.mrb[0].mxu0 }
 0x3ed   : > { %v5601_v36 = vadd.f32 %v5600_v34, %v4272_v27  ;;  %v4274_v37 = vpop.f32.mrb[1].mxu0  ;;  %v4785_v27 = vsub.s32 (!%p5591_p4), 3, %v7820_v28 }
 0x3ee   : > { %v5603_v38 = vadd.f32 %v5602_v35, %v4274_v37  ;;  %v4276_v40 = vpop.f32.mrb[2].mxu0  ;;  %v4781_v35 = vsub.s32 (!%p5591_p4), 2, %v7820_v28  ;;  %v4769_v37 = vld [vmem:[#allocation11] sm:$0xf] (!%p5591_p4) }
 0x3ef   : > { %v4279_v41 = vmax.f32 %v5601_v36, 0.0  ;;  %v4277_v42 = vpop.f32.mrb[3].mxu0  ;;  %v4774_v40 = vrot.slane (!%p5591_p4), %v4769_v37, %v7823_v29 }
 0x3f0   : > { %v4280_v43 = vmax.f32 %v5603_v38, 0.0  ;;  %v4799_v38 = vld [vmem:[#allocation12] sm:$0xf] (!%p5591_p4)  ;;  %v4782_v42 = vrot.slane (!%p5591_p4), %v4769_v37, %v4781_v35 }
 0x3f1   : > { %v7832_v46 = vpack.c.bf16 %v4279_v41, %v4279_v41  ;;  %v4778_v41 = vrot.slane (!%p5591_p4), %v4769_v37, %v7827_v30 }
 0x3f2   : > { %v4286_v44 = vpack.c.bf16 %v4280_v43, %v4280_v43  ;;  %v4786_v43 = vrot.slane (!%p5591_p4), %v4769_v37, %v4785_v27 }
 0x3f4   : > { %4703 = vmatprep.mubr.bf16.mxu1 %v4286_v44 }
 0x3f5   : > { %4704 = vmatmul.mubr.bf16.vlgmr.msra.gmra.mrb[4].mxu1 %v7832_v46 }
 0x3f6   : > { %4713 = vmatpush1.bf16.msra.mxu1 %v6594_v45  ;;  %4744 = vmatprep.mubr.bf16.mxu1 %v4286_v44  ;;  %v4804_v44 = vrot.slane (!%p5591_p4), %v4799_v38, %v7823_v29  ;;  %v4808_v45 = vrot.slane (!%p5591_p4), %v4799_v38, %v7827_v30  ;;  %v5592_v29 = vld [vmem:[#allocation3] ss:$0 sm:$0xff] (!%p5591_p4) }
 0x3f7   : > { %4714 = vmatprep.subr.bf16.mxu1 %v6599_v47 }
 0x3fa   : > { %4715 = vmatpush1.bf16.msra.mxu1 %v6597_v26 }
 0x3fb   : > { %4716 = vmatprep.subr.bf16.mxu1 %v6602_v39 }
 0x3fe   : > { %4717 = vmatpush1.bf16.msra.mxu1 %v6600_v48 }
 0x3ff   : > { %4718 = vmatprep.subr.bf16.mxu1 %v6605_v49  ;;  %v4816_v49 = vrot.slane (!%p5591_p4), %v4799_v38, %v4785_v27 }
 0x402   : > { %4719 = vmatpush1.bf16.msra.mxu1 %v6603_v50 }
 0x403   : > { %4720 = vmatprep.subr.bf16.mxu1 %v6608_v20 }
 0x406   : > { %4721 = vmatpush1.bf16.msra.mxu1 %v6606_v31 }
 0x407   : > { %4722 = vmatprep.subr.bf16.mxu1 %v6611_v51 }
 0x40a   : > { %4723 = vmatpush1.bf16.msra.mxu1 %v6609_v52 }
 0x40b   : > { %4724 = vmatprep.subr.bf16.mxu1 %v6614_v53 }
 0x40e   : > { %4725 = vmatpush1.bf16.msra.mxu1 %v6612_v54 }
 0x40f   : > { %4726 = vmatprep.subr.bf16.mxu1 %v6617_v55 }
 0x412   : > { %4727 = vmatpush1.bf16.msra.mxu1 %v6615_v56 }
 0x413   : > { %4728 = vmatprep.subr.bf16.mxu1 %v6620_v57 }
 0x416   : > { %4729 = vmatpush1.bf16.msra.mxu1 %v6618_v58 }
 0x417   : > { %4730 = vmatprep.subr.bf16.mxu1 %v6623_v59 }
 0x41a   : > { %4731 = vmatpush1.bf16.msra.mxu1 %v6621_v60 }
 0x41b   : > { %4732 = vmatprep.subr.bf16.mxu1 %v6626_v61 }
 0x41e   : > { %4733 = vmatpush1.bf16.msra.mxu1 %v6624_v62 }
 0x41f   : > { %4734 = vmatprep.subr.bf16.mxu1 %v6629_v63 }
 0x422   : > { %4735 = vmatpush1.bf16.msra.mxu1 %v6627_v0 }
 0x423   : > { %4736 = vmatprep.subr.bf16.mxu1 %v6632_v1 }
 0x426   : > { %4737 = vmatpush1.bf16.msra.mxu1 %v6630_v2 }
 0x427   : > { %4738 = vmatprep.subr.bf16.mxu1 %v6635_v3 }
 0x42a   : > { %4739 = vmatpush1.bf16.msra.mxu1 %v6633_v4 }
 0x42b   : > { %4740 = vmatprep.subr.bf16.mxu1 %v6638_v5 }
 0x42e   : > { %4741 = vmatpush1.bf16.msra.mxu1 %v6636_v6 }
 0x42f   : > { %4742 = vmatprep.subr.bf16.mxu1 %v6641_v7 }
 0x432   : > { %4743 = vmatpush1.bf16.msra.mxu1 %v6639_v8 }
 0x435   : > { %4745 = vmatmul.mubr.bf16.vlgmr.msra.gmra.mrb[8].mxu1 %v7832_v46  ;;  %v4812_v46 = vrot.slane (!%p5591_p4), %v4799_v38, %v4781_v35 }
 0x4c8   : > { %v4705_v11 = vpop.f32.mrb[4].mxu1 }
 0x4c9   : > { %v4753_v12 = vadd.f32 %v4705_v11, %v4281_v9  ;;  %v4707_v13 = vpop.f32.mrb[5].mxu1 }
 0x4ca   : > { %v4754_v14 = vadd.f32 %v4707_v13, %v4282_v10  ;;  %v4709_v15 = vpop.f32.mrb[6].mxu1 }
 0x4cb   : > { %4757 = vst [vmem:[#allocation2] sm:$0xff] %v4753_v12  ;;  %v4710_v16 = vpop.f32.mrb[7].mxu1 }
 0x4cc   : > { %4758 = vst [vmem:[#allocation2 + $0x8] sm:$0xff] %v4754_v14 }
 0x4d2   : > { %v4765_v32 = vld [vmem:[#allocation2] sm:$0xff] (!%p5591_p4) }
 0x4d3   : > { %v4766_v33 = vld [vmem:[#allocation2 + $0x8] sm:$0xff] (!%p5591_p4)  ;;  %v4791_v47 = vadd.f32 (!%p5591_p4), %v4774_v40, %v4765_v32 }
 0x4d4   : > { %v4792_v26 = vadd.f32 (!%p5591_p4), %v4778_v41, %v4766_v33 }
 0x4d5   : > { %v4795_v28 = vmax.f32 (!%p5591_p4), %v4791_v47, 0.0 }
 0x4d6   : > { %v4796_v50 = vmax.f32 (!%p5591_p4), %v4792_v26, 0.0 }
 0x4d7   : > { %v4821_v51 = vmul.f32 (!%p5591_p4), %v4804_v44, %v4795_v28 }
 0x4d8   : > { %v4822_v52 = vmul.f32 (!%p5591_p4), %v4808_v45, %v4796_v50 }
 0x4da   : > { %v4825_v55 = vadd.f32 (!%p5591_p4), %v4822_v52, %v4821_v51 }
 0x506   : > { %4764 = sbr.rel (%p5591_p4) target bundleno = 1480 (0x5c8), region = 80 }
 0x508   : > { %v4746_v19 = vpop.f32.mrb[8].mxu1 }
 0x509   : > { %v4755_v21 = vadd.f32 %v4746_v19, %v4283_v17  ;;  %v4748_v23 = vpop.f32.mrb[9].mxu1 }
 0x50a   : > { %v4756_v24 = vadd.f32 %v4748_v23, %v4284_v18  ;;  %v4750_v25 = vpop.f32.mrb[10].mxu1 }
 0x50b   : > { %4759 = vst [vmem:[#allocation2 + $0x10] sm:$0xff] %v4755_v21  ;;  %v4751_v22 = vpop.f32.mrb[11].mxu1 }
 0x50c   : > { %4760 = vst [vmem:[#allocation2 + $0x18] sm:$0xff] %v4756_v24 }
 0x512   : > { %v4767_v34 = vld [vmem:[#allocation2 + $0x10] sm:$0xff] }
 0x513   : > { %v4768_v36 = vld [vmem:[#allocation2 + $0x18] sm:$0xff]  ;;  %v4793_v39 = vadd.f32 %v4782_v42, %v4767_v34 }
 0x514   : > { %v4794_v48 = vadd.f32 %v4786_v43, %v4768_v36 }
 0x515   : > { %v4797_v20 = vmax.f32 %v4793_v39, 0.0 }
 0x516   : > { %v4798_v31 = vmax.f32 %v4794_v48, 0.0 }
 0x517   : > { %v4823_v53 = vmul.f32 %v4812_v46, %v4797_v20 }
 0x518   : > { %v4824_v54 = vmul.f32 %v4816_v49, %v4798_v31 }
 0x519   : > { %v4826_v56 = vadd.f32 %v4825_v55, %v4823_v53 }
 0x51b   : > { %v4827_v57 = vadd.f32 %v4826_v56, %v4824_v54 }
 0x51d   : > { %4828 = vadd.xlane.f32.xlu0 %v4827_v57 }
 0x5aa   : > { %v4829_v30 = vpop.xlane.xlu0 %4828 }
 0x5ab   : > { %v4837_v58 = vadd.f32 %v5592_v29, %v4829_v30 }
 0x5ad   : > { %v5593_v59 = vmul.f32 -1.442695, %v4837_v58 }
 0x5af   : > { %6642 = vpow2.f32 %v5593_v59 }
 0x5b9   : > { %v6643_v60 = vpop.eup %6642 }
 0x5ba   : > { %v4841_v61 = vadd.f32 1.0, %v6643_v60 }
 0x5bc   : > { %6644 = vrcp.f32 %v4841_v61 }
 0x5c6   : > { %v6645_v62 = vpop.eup %6644 }
 0x5c7   : > { %4845 = vst.msk [vmem:[%s7942_s24] sm:$0xff] %vm4844_vm0, %v6645_v62 }
 0x5c8 PF: > { %s7943_s29 = sld [smem:[#allocation20_spill]]  ;;  %s7944_s4 = sld [smem:[#allocation19_spill]] }
 0x5c9   : > { %s7945_s28 = sld [smem:[#allocation21_spill]]  ;;  %s7946_s26 = smov %s6862_s27 }
 0x5ce   : > { %p24_p8 = scmp.ge.s32.totalorder %s7943_s29, 10   ;;  %s7947_s27 = smov %s7944_s4 }
 0x5d0   :  { %26 = sbr.rel (!%p24_p8) target bundleno = 11 (0xb), region = 129 }
 0x5d7   :  { %4857 = vsyncpa [#allocation5], 1 }
 0x5d8   :  { %4859 = vsyncpa [#allocation5 + $0x1], 1 }
 0x5d9   :  { %4860 = vsyncpa [#allocation7], 1 }
 0x5da   :  { %4862 = vsyncpa [#allocation7 + $0x1], 1 }
 0x5db   :  { %4863 = vsyncpa [#allocation10], 1 }
 0x5dc   :  { %4865 = vsyncpa [#allocation10 + $0x1], 1 }
 0x5dd   :  { %4866 = vsyncpa [#allocation13], 1 }

</bundles_post_ra>
